<compile_context>
chip_gen: v5e
topology: v5e:2x2
jax: 0.10.0
libtpu: 0.0.40
codegen_flags: <defaults>
</compile_context>

<pallas_src>
import jax
import jax.numpy as jnp
from jax.experimental import pallas as pl
from jax.experimental.pallas import tpu as pltpu

OUT_PAD = 128   # lane-dense padded projection width (true width = 10)


def _mlp_kernel(x_ref, w1_ref, b1_ref, w2_ref, b2_ref, o_ref):
    # First linear: (TB,784) @ (784,512) + (1,512), then ReLU.  All math in f32
    # to keep the 4-decimal rounding below exact vs. the torch f32 path.
    h = jnp.dot(x_ref[...], w1_ref[...], preferred_element_type=jnp.float32)
    h = jnp.maximum(h + b1_ref[...], 0.0)
    # TODO(synk): nn.Dropout(p=0.2) uses torch's RNG stream; eval-mode identity
    # is implemented here (training-mode mask is not reproducible from JAX).
    # Projection: (TB,512) @ (512,128 padded) + (1,128 padded)
    logits = jnp.dot(h, w2_ref[...], preferred_element_type=jnp.float32)
    logits = logits + b2_ref[...]
    # Exact sigmoid (exp hits the EUP; divide is cheap vs. the matmuls).
    # pl.reciprocal(approx=True) could flip values on the .00005 boundary.
    y = 1.0 / (1.0 + jnp.exp(-logits))
    # torch.round(x, decimals=4): round-half-to-even at 4 decimals.
    o_ref[...] = jnp.round(y * 1e4) * 1e-4


def _cdiv(a, b):
    return -(-a // b)


def _round_up(x, m):
    return _cdiv(x, m) * m


def prepare_params(w1, b1, w2, b2):
    """One-time lane-dense padding of the projection to OUT_PAD output lanes.
    Call once at init; avoids a per-forward jnp.pad + extra HBM copy."""
    n = w2.shape[1]
    w2p = jnp.pad(w2, ((0, 0), (0, OUT_PAD - n)))
    b2p = jnp.pad(b2, ((0, 0), (0, OUT_PAD - n)))
    return w1, b1, w2p, b2p, n


def mlp_forward(images, w1, b1, w2, b2, *, n_out=10, tb=1024):
    """images: (B, 784) f32. w1 (784,512), b1 (1,512),
    w2/b2 either pre-padded to (512,128)/(1,128) (preferred, via prepare_params)
    or raw (512,n_out)/(1,n_out).  Returns (B, n_out) f32."""
    B, d_in = images.shape
    H = w1.shape[1]
    if w2.shape[1] != OUT_PAD:              # caller passed raw projection
        n_out = w2.shape[1]
        w2 = jnp.pad(w2, ((0, 0), (0, OUT_PAD - n_out)))
        b2 = jnp.pad(b2, ((0, 0), (0, OUT_PAD - n_out)))

    # --- adaptive batch tiling --------------------------------------------
    # Pick n_tiles so that (a) TB <= tb, (b) padding waste is minimal
    # (B=300 -> 2x152 instead of 1x512), (c) v7x megacore gets >=2 grid steps
    # (>=4 for larger batches so the x-tile DMA pipelines within each TC).
    n_tiles = _cdiv(B, tb)
    if B > 8:
        n_tiles = max(n_tiles, 2)
    if B > 512:
        n_tiles = max(n_tiles, 4)
    TB = _round_up(_cdiv(B, n_tiles), 8)     # multiple of 8 sublanes
    Bp = n_tiles * TB
    if Bp != B:
        images = jnp.pad(images, ((0, Bp - B), (0, 0)))

    # --- VMEM budget (derived, no hand-tuned clamp) -------------------------
    # Weights/biases are single-buffered (constant index_map + Buffered(1));
    # x/out tiles are double-buffered; plus the (TB,512) f32 intermediate and
    # headroom.  Cap at 48 MiB: safe under v7x's 64 MiB, far under 128 MiB on
    # v5e/v6e (and well above v5e's 16 MiB scoped default).
    w_bytes = w1.nbytes + b1.nbytes + w2.nbytes + b2.nbytes
    tile_bytes = 2 * 4 * TB * (d_in + OUT_PAD)   # double-buffered x + out
    h_bytes = 4 * TB * H
    vmem_bytes = int(min(max(w_bytes + tile_bytes + h_bytes + (8 << 20),
                             16 << 20), 48 << 20))

    const = pl.Buffered(1)   # constant blocks: no re-DMA, no dead 2nd buffer
    out = pl.pallas_call(
        _mlp_kernel,
        out_shape=jax.ShapeDtypeStruct((Bp, OUT_PAD), jnp.float32),
        grid=(n_tiles,),
        in_specs=[
            pl.BlockSpec((TB, d_in), lambda i: (i, 0)),   # batch-tiled input
            pl.BlockSpec((d_in, H), lambda i: (0, 0), pipeline_mode=const),
            pl.BlockSpec((1, H), lambda i: (0, 0), pipeline_mode=const),
            pl.BlockSpec((H, OUT_PAD), lambda i: (0, 0), pipeline_mode=const),
            pl.BlockSpec((1, OUT_PAD), lambda i: (0, 0), pipeline_mode=const),
        ],
        out_specs=pl.BlockSpec((TB, OUT_PAD), lambda i: (i, 0)),
        compiler_params=pltpu.CompilerParams(
            dimension_semantics=("parallel",),   # megacore sharding on v7x
            vmem_limit_bytes=vmem_bytes,
        ),
    )(images, w1, b1, w2, b2)
    return out[:B, :n_out]


def init_params(key):
    """Deterministic init mimicking nn.Linear default U(-1/sqrt(fan_in), +)."""
    k1, k2, k3, k4 = jax.random.split(key, 4)
    bound1 = 1.0 / jnp.sqrt(784.0)
    bound2 = 1.0 / jnp.sqrt(512.0)
    # Stored already transposed: (in, out)
    w1 = jax.random.uniform(k1, (784, 512), jnp.float32, -bound1, bound1)
    b1 = jax.random.uniform(k2, (1, 512), jnp.float32, -bound1, bound1)
    w2 = jax.random.uniform(k3, (512, 10), jnp.float32, -bound2, bound2)
    b2 = jax.random.uniform(k4, (1, 10), jnp.float32, -bound2, bound2)
    return w1, b1, w2, b2


def _reference(images, w1, b1, w2, b2):
    h = jnp.maximum(images @ w1 + b1, 0.0)
    y = jax.nn.sigmoid(h @ w2 + b2)
    return jnp.round(y * 1e4) * 1e-4


if __name__ == "__main__":
    key = jax.random.PRNGKey(0)
    k_x, k_p, k_x2 = jax.random.split(key, 3)
    w1, b1, w2, b2 = init_params(k_p)
    # One-time lane-dense padding of the projection (not per forward call).
    w1k, b1k, w2p, b2p, n_out = prepare_params(w1, b1, w2, b2)

    # Small inference batch (latency path: single 8-row tile, weights dominate).
    B = 4
    images = jax.random.uniform(k_x, (B, 784), jnp.float32)
    out = jax.block_until_ready(mlp_forward(images, w1k, b1k, w2p, b2p, n_out=n_out))
    ref = _reference(images, w1, b1, w2, b2)
    assert out.shape == (B, 10)
    # Tolerance = rounding quantum (+eps): half-even boundary values may flip.
    assert jnp.max(jnp.abs(out - ref)) <= 1e-4 + 1e-6, "mismatch vs reference (B=4)"

    # Larger batch: exercises adaptive tiling (2 x 152) + padding path.
    B2 = 300
    images2 = jax.random.uniform(k_x2, (B2, 784), jnp.float32)
    out2 = jax.block_until_ready(mlp_forward(images2, w1k, b1k, w2p, b2p, n_out=n_out))
    ref2 = _reference(images2, w1, b1, w2, b2)
    assert out2.shape == (B2, 10)
    assert jnp.max(jnp.abs(out2 - ref2)) <= 1e-4 + 1e-6, "mismatch vs reference (B=300)"

    print("KERNEL_OK")
</pallas_src>

<mosaic_0001>
module attributes {stable_mosaic.version = 11 : i64} {
  func.func @_mlp_kernel(%arg0: i32, %arg1: memref<8x784xf32, #tpu.memory_space<vmem>>, %arg2: memref<784x512xf32, #tpu.memory_space<vmem>>, %arg3: memref<1x512xf32, #tpu.memory_space<vmem>>, %arg4: memref<512x128xf32, #tpu.memory_space<vmem>>, %arg5: memref<1x128xf32, #tpu.memory_space<vmem>>, %arg6: memref<8x128xf32, #tpu.memory_space<vmem>>) attributes {dimension_semantics = [#tpu.dimension_semantics<parallel>], iteration_bounds = array<i64: 1>, scalar_prefetch = 0 : i64, scratch_operands = 0 : i64, tpu.core_type = #tpu.core_type<tc>, window_params = [{transform_indices = @transform_0, window_bounds = array<i64: 8, 784>}, {pipeline_mode = #tpu.pipeline_mode<synchronous>, transform_indices = @transform_1, window_bounds = array<i64: 784, 512>}, {pipeline_mode = #tpu.pipeline_mode<synchronous>, transform_indices = @transform_2, window_bounds = array<i64: 1, 512>}, {pipeline_mode = #tpu.pipeline_mode<synchronous>, transform_indices = @transform_3, window_bounds = array<i64: 512, 128>}, {pipeline_mode = #tpu.pipeline_mode<synchronous>, transform_indices = @transform_4, window_bounds = array<i64: 1, 128>}, {transform_indices = @transform_5, window_bounds = array<i64: 8, 128>}]} {
    %c0 = arith.constant 0 : index
    %c0_0 = arith.constant 0 : index
    %0 = vector.load %arg1[%c0, %c0_0] : memref<8x784xf32, #tpu.memory_space<vmem>>, vector<8x784xf32>
    %c0_1 = arith.constant 0 : index
    %c0_2 = arith.constant 0 : index
    %1 = vector.load %arg2[%c0_1, %c0_2] : memref<784x512xf32, #tpu.memory_space<vmem>>, vector<784x512xf32>
    %cst = arith.constant dense<0.000000e+00> : vector<8x512xf32>
    %2 = tpu.matmul %0, %1, %cst {dimension_numbers = #tpu.dot_dimension_numbers<[1], [0], [0], [1], [0, 0, 1, 1], [], []>} : vector<8x784xf32>, vector<784x512xf32>, vector<8x512xf32> -> vector<8x512xf32>
    %c0_3 = arith.constant 0 : index
    %c0_4 = arith.constant 0 : index
    %3 = vector.load %arg3[%c0_3, %c0_4] : memref<1x512xf32, #tpu.memory_space<vmem>>, vector<1x512xf32>
    %4 = vector.broadcast %3 : vector<1x512xf32> to vector<8x512xf32>
    %5 = arith.addf %2, %4 : vector<8x512xf32>
    %cst_5 = arith.constant 0.000000e+00 : f32
    %6 = vector.broadcast %cst_5 : f32 to vector<8x512xf32>
    %7 = arith.maximumf %5, %6 : vector<8x512xf32>
    %c0_6 = arith.constant 0 : index
    %c0_7 = arith.constant 0 : index
    %8 = vector.load %arg4[%c0_6, %c0_7] : memref<512x128xf32, #tpu.memory_space<vmem>>, vector<512x128xf32>
    %cst_8 = arith.constant dense<0.000000e+00> : vector<8x128xf32>
    %9 = tpu.matmul %7, %8, %cst_8 {dimension_numbers = #tpu.dot_dimension_numbers<[1], [0], [0], [1], [0, 0, 1, 1], [], []>} : vector<8x512xf32>, vector<512x128xf32>, vector<8x128xf32> -> vector<8x128xf32>
    %c0_9 = arith.constant 0 : index
    %c0_10 = arith.constant 0 : index
    %10 = vector.load %arg5[%c0_9, %c0_10] : memref<1x128xf32, #tpu.memory_space<vmem>>, vector<1x128xf32>
    %11 = vector.broadcast %10 : vector<1x128xf32> to vector<8x128xf32>
    %12 = arith.addf %9, %11 : vector<8x128xf32>
    %cst_11 = arith.constant 0.000000e+00 : f32
    %13 = vector.broadcast %cst_11 : f32 to vector<8x128xf32>
    %14 = arith.subf %13, %12 : vector<8x128xf32>
    %15 = math.exp %14 : vector<8x128xf32>
    %cst_12 = arith.constant 1.000000e+00 : f32
    %16 = vector.broadcast %cst_12 : f32 to vector<8x128xf32>
    %17 = arith.addf %16, %15 : vector<8x128xf32>
    %cst_13 = arith.constant 1.000000e+00 : f32
    %18 = vector.broadcast %cst_13 : f32 to vector<8x128xf32>
    %19 = arith.divf %18, %17 : vector<8x128xf32>
    %cst_14 = arith.constant 1.000000e+04 : f32
    %20 = vector.broadcast %cst_14 : f32 to vector<8x128xf32>
    %21 = arith.mulf %19, %20 : vector<8x128xf32>
    %22 = math.roundeven %21 : vector<8x128xf32>
    %cst_15 = arith.constant 9.99999974E-5 : f32
    %23 = vector.broadcast %cst_15 : f32 to vector<8x128xf32>
    %24 = arith.mulf %22, %23 : vector<8x128xf32>
    %c0_16 = arith.constant 0 : index
    %c0_17 = arith.constant 0 : index
    %25 = vector.load %arg6[%c0_16, %c0_17] : memref<8x128xf32, #tpu.memory_space<vmem>>, vector<8x128xf32>
    tpu.vector_store %arg6[%c0_16, %c0_17], %24 {strides = array<i32>} : memref<8x128xf32, #tpu.memory_space<vmem>>, vector<8x128xf32>,
    return
  }
  func.func @transform_0(%arg0: i32) -> (i32, i32) {
    %c0_i32 = arith.constant 0 : i32
    %c0_i32_0 = arith.constant 0 : i32
    return %arg0, %c0_i32 : i32, i32
  }
  func.func @transform_1(%arg0: i32) -> (i32, i32) {
    %c0_i32 = arith.constant 0 : i32
    %c0_i32_0 = arith.constant 0 : i32
    %c0_i32_1 = arith.constant 0 : i32
    return %c0_i32, %c0_i32_0 : i32, i32
  }
  func.func @transform_2(%arg0: i32) -> (i32, i32) {
    %c0_i32 = arith.constant 0 : i32
    %c0_i32_0 = arith.constant 0 : i32
    %c0_i32_1 = arith.constant 0 : i32
    return %c0_i32, %c0_i32_0 : i32, i32
  }
  func.func @transform_3(%arg0: i32) -> (i32, i32) {
    %c0_i32 = arith.constant 0 : i32
    %c0_i32_0 = arith.constant 0 : i32
    %c0_i32_1 = arith.constant 0 : i32
    return %c0_i32, %c0_i32_0 : i32, i32
  }
  func.func @transform_4(%arg0: i32) -> (i32, i32) {
    %c0_i32 = arith.constant 0 : i32
    %c0_i32_0 = arith.constant 0 : i32
    %c0_i32_1 = arith.constant 0 : i32
    return %c0_i32, %c0_i32_0 : i32, i32
  }
  func.func @transform_5(%arg0: i32) -> (i32, i32) {
    %c0_i32 = arith.constant 0 : i32
    %c0_i32_0 = arith.constant 0 : i32
    return %arg0, %c0_i32 : i32, i32
  }
}

</mosaic_0001>

<bundles_post_ra>
// kernel: tpu_custom_call.1
= control target key start
LH: loop header
LB: loop body
LE: loop exit
PB: predicated region body
PF: predicated region fallthrough
CT: control target
= control target key end

     0   :  { %10 = vsyncpa [#allocation3], 0  ;;  %s1549_s0 = inlined_call_operand.hbm [shape: f32[8,784], index: 0, kind: input, shape index: {}]   ;;  %s1550_s1 = inlined_call_operand.hbm [shape: f32[784,512], index: 1, kind: input, shape index: {}]   ;;  %s1551_s2 = inlined_call_operand.hbm [shape: f32[1,512], index: 2, kind: input, shape index: {}]   ;;  %s1552_s3 = inlined_call_operand.hbm [shape: f32[512,128], index: 3, kind: input, shape index: {}]   ;;  %s1553_s4 = inlined_call_operand.hbm [shape: f32[1,128], index: 4, kind: input, shape index: {}]   ;;  %s1554_s5 = inlined_call_operand.hbm [shape: f32[8,128], index: 5, kind: output, shape index: {}]  }
   0x1   :  { %11 = vsyncpa [#allocation6], 0 }
   0x2   :  { %12 = vsyncpa [#allocation9], 0  ;;  %s29_s20 = sshll.u32 %s1550_s1, 4  ;;  %s30_s20 = int_to_ptr.hbm [resolvable:$true] %s29_s20 }
   0x3   :  { %13 = vsyncpa [#allocation4], 0  ;;  %s1446_s21 = smov [#allocation5]   ;;  %s53_s25 = sshll.u32 %s1552_s3, 4  ;;  %s54_s25 = int_to_ptr.hbm [resolvable:$true] %s53_s25 }
   0x4   :  { %s31_s22 = sshll.u32 %s1446_s21, 4  ;;  %s1447_s26 = smov 512   ;;  %s32_s22 = int_to_ptr.vmem [resolvable:$true] %s31_s22 }
   0x5   :  { %s1448_s27 = smov 32   ;;  %s1449_s28 = smov [#allocation8]  }
   0x6   :  { %37 = dma.hbm_to_vmem [thread:$0]  %s30_s20, 50176, %s32_s22, [#allocation6], %s1447_s26, %s1447_s26, %s1448_s27  }
   0x7   :  { %s55_s29 = sshll.u32 %s1449_s28, 4  ;;  %s1450_s30 = smov 128   ;;  %s56_s29 = int_to_ptr.vmem [resolvable:$true] %s55_s29 }
   0x8   :  { %s1451_s6 = smov 8   ;;  %s19_s8 = sshll.u32 %s1549_s0, 4  ;;  %s20_s8 = int_to_ptr.hbm [resolvable:$true] %s19_s8 }
   0x9   :  { %61 = dma.hbm_to_vmem [thread:$0]  %s54_s25, 8192, %s56_s29, [#allocation9], %s1450_s30, %s1450_s30, %s1451_s6  }
   0xa   :  { %s1452_s9 = smov [#allocation2]   ;;  %s43_s12 = sshll.u32 %s1551_s2, 4  ;;  %s44_s12 = int_to_ptr.hbm [resolvable:$true] %s43_s12 }
   0xb   :  { %s21_s10 = sshll.u32 %s1452_s9, 4  ;;  %s1453_s13 = smov [#allocation7]   ;;  %s22_s10 = int_to_ptr.vmem [resolvable:$true] %s21_s10 }
   0xc   :  { %24 = dma.hbm_to_vmem [thread:$0]  %s20_s8, 896, %s22_s10, [#allocation3]  }
   0xd   :  { %s45_s14 = sshll.u32 %s1453_s13, 4  ;;  %s67_s17 = sshll.u32 %s1553_s4, 4  ;;  %s46_s14 = int_to_ptr.vmem [resolvable:$true] %s45_s14  ;;  %s68_s17 = int_to_ptr.hbm [resolvable:$true] %s67_s17 }
   0xe   :  { %48 = dma.hbm_to_vmem [thread:$0]  %s44_s12, 64, %s46_s14, [#allocation6]  }
   0xf   :  { %s1454_s0 = smov [#allocation10]  }
  0x10   :  { %s69_s18 = sshll.u32 %s1454_s0, 4  ;;  %s70_s18 = int_to_ptr.vmem [resolvable:$true] %s69_s18 }
  0x11   :  { %72 = dma.hbm_to_vmem [thread:$0]  %s68_s17, 16, %s70_s18, [#allocation9]  }
  0x12   :  { %1438 = dma.done.wait [#allocation3], 896  }
  0x13   :  { %1439 = vsyncadd [#allocation3], 4294966400 }
  0x14   :  { %1440 = dma.done.wait [#allocation6], 50240  }
  0x15   :  { %1441 = vsyncadd [#allocation6], 4294917056 }
  0x16   :  { %1442 = dma.done.wait [#allocation9], 8208  }
  0x17   :  { %1443 = vsyncadd [#allocation9], 4294959088  ;;  %v160_v0 = vld [vmem:[#allocation5 + $0x1e0] sm:$0xff]  ;;  %vm502_vm0 = vcmask 130048   ;;  %s1455_s2 = smov [#allocation11]   ;;  %s1248_s21 = sshll.u32 %s1554_s5, 4  ;;  %s1249_s21 = int_to_ptr.hbm [resolvable:$true] %s1248_s21 }
  0x18   :  { %v224_v1 = vld [vmem:[#allocation5 + $0x3e0] sm:$0xff]  ;;  %506 = vmatpush.msra.mxu0 %v160_v0  ;;  %s1246_s4 = sshll.u32 %s1455_s2, 4  ;;  %s1247_s4 = int_to_ptr.vmem [resolvable:$true] %s1246_s4 }
  0x19   :  { %v352_v2 = vld [vmem:[#allocation5 + $0x7e0] sm:$0xff]  ;;  %526 = vmatpush.msra.mxu1 %v224_v1  ;;  %v161_v1 = vld [vmem:[#allocation5 + $0x1e8] sm:$0xff] }
  0x1a   :  { %v156_v3 = vld [vmem:[#allocation5 + $0x1c0] sm:$0xff]  ;;  %566 = vmatpush.msra.mxu3 %v352_v2 }
  0x1b   :  { %v220_v4 = vld [vmem:[#allocation5 + $0x3c0] sm:$0xff]  ;;  %507 = vmatpush.msra.mxu0 %v156_v3 }
  0x1c   :  { %v288_v5 = vld [vmem:[#allocation5 + $0x5e0] sm:$0xff]  ;;  %527 = vmatpush.msra.mxu1 %v220_v4 }
  0x1d   :  { %546 = vmatpush.msra.mxu2 %v288_v5  ;;  %v348_v6 = vld [vmem:[#allocation5 + $0x7c0] sm:$0xff] }
  0x1e   :  { %v152_v7 = vld [vmem:[#allocation5 + $0x1a0] sm:$0xff]  ;;  %567 = vmatpush.msra.mxu3 %v348_v6  ;;  %v157_v6 = vld [vmem:[#allocation5 + $0x1c8] sm:$0xff] }
  0x1f   :  { %v216_v8 = vld [vmem:[#allocation5 + $0x3a0] sm:$0xff]  ;;  %508 = vmatpush.msra.mxu0 %v152_v7 }
  0x20   :  { %v284_v9 = vld [vmem:[#allocation5 + $0x5c0] sm:$0xff]  ;;  %528 = vmatpush.msra.mxu1 %v216_v8 }
  0x21   :  { %v344_v10 = vld [vmem:[#allocation5 + $0x7a0] sm:$0xff]  ;;  %547 = vmatpush.msra.mxu2 %v284_v9 }
  0x22   :  { %v148_v11 = vld [vmem:[#allocation5 + $0x180] sm:$0xff]  ;;  %568 = vmatpush.msra.mxu3 %v344_v10  ;;  %v153_v10 = vld [vmem:[#allocation5 + $0x1a8] sm:$0xff] }
  0x23   :  { %v212_v12 = vld [vmem:[#allocation5 + $0x380] sm:$0xff]  ;;  %509 = vmatpush.msra.mxu0 %v148_v11  ;;  %v1501_v11 = vld [vmem:[#allocation2 + $0x10] sm:$0xff] }
  0x24   :  { %v280_v13 = vld [vmem:[#allocation5 + $0x5a0] sm:$0xff]  ;;  %529 = vmatpush.msra.mxu1 %v212_v12  ;;  %v225_v12 = vld [vmem:[#allocation5 + $0x3e8] sm:$0xff] }
  0x25   :  { %v340_v14 = vld [vmem:[#allocation5 + $0x780] sm:$0xff]  ;;  %548 = vmatpush.msra.mxu2 %v280_v13 }
  0x26   :  { %v276_v15 = vld [vmem:[#allocation5 + $0x580] sm:$0xff]  ;;  %569 = vmatpush.msra.mxu3 %v340_v14 }
  0x27   :  { %v144_v16 = vld [vmem:[#allocation5 + $0x160] sm:$0xff]  ;;  %549 = vmatpush.msra.mxu2 %v276_v15  ;;  %v149_v15 = vld [vmem:[#allocation5 + $0x188] sm:$0xff] }
  0x28   :  { %v208_v17 = vld [vmem:[#allocation5 + $0x360] sm:$0xff]  ;;  %510 = vmatpush.msra.mxu0 %v144_v16  ;;  %v1504_v16 = vld [vmem:[#allocation2] sm:$0xff] }
  0x29   :  { %v336_v18 = vld [vmem:[#allocation5 + $0x760] sm:$0xff]  ;;  %530 = vmatpush.msra.mxu1 %v208_v17 }
  0x2a   :  { %v272_v19 = vld [vmem:[#allocation5 + $0x560] sm:$0xff]  ;;  %570 = vmatpush.msra.mxu3 %v336_v18  ;;  %v221_v18 = vld [vmem:[#allocation5 + $0x3c8] sm:$0xff] }
  0x2b   :  { %v140_v20 = vld [vmem:[#allocation5 + $0x140] sm:$0xff]  ;;  %550 = vmatpush.msra.mxu2 %v272_v19 }
  0x2c   :  { %v204_v21 = vld [vmem:[#allocation5 + $0x340] sm:$0xff]  ;;  %511 = vmatpush.msra.mxu0 %v140_v20 }
  0x2d   :  { %v332_v22 = vld [vmem:[#allocation5 + $0x740] sm:$0xff]  ;;  %531 = vmatpush.msra.mxu1 %v204_v21  ;;  %v145_v21 = vld [vmem:[#allocation5 + $0x168] sm:$0xff] }
  0x2e   :  { %v268_v23 = vld [vmem:[#allocation5 + $0x540] sm:$0xff]  ;;  %571 = vmatpush.msra.mxu3 %v332_v22  ;;  %v1510_v22 = vld [vmem:[#allocation2 + $0x8] sm:$0xff] }
  0x2f   :  { %v136_v24 = vld [vmem:[#allocation5 + $0x120] sm:$0xff]  ;;  %551 = vmatpush.msra.mxu2 %v268_v23  ;;  %v217_v23 = vld [vmem:[#allocation5 + $0x3a8] sm:$0xff] }
  0x30   :  { %v200_v25 = vld [vmem:[#allocation5 + $0x320] sm:$0xff]  ;;  %512 = vmatpush.msra.mxu0 %v136_v24 }
  0x31   :  { %v328_v26 = vld [vmem:[#allocation5 + $0x720] sm:$0xff]  ;;  %532 = vmatpush.msra.mxu1 %v200_v25 }
  0x32   :  { %v264_v27 = vld [vmem:[#allocation5 + $0x520] sm:$0xff]  ;;  %572 = vmatpush.msra.mxu3 %v328_v26  ;;  %v141_v26 = vld [vmem:[#allocation5 + $0x148] sm:$0xff] }
  0x33   :  { %v132_v28 = vld [vmem:[#allocation5 + $0x100] sm:$0xff]  ;;  %552 = vmatpush.msra.mxu2 %v264_v27  ;;  %v213_v27 = vld [vmem:[#allocation5 + $0x388] sm:$0xff] }
  0x34   :  { %v196_v29 = vld [vmem:[#allocation5 + $0x300] sm:$0xff]  ;;  %513 = vmatpush.msra.mxu0 %v132_v28 }
  0x35   :  { %v324_v30 = vld [vmem:[#allocation5 + $0x700] sm:$0xff]  ;;  %533 = vmatpush.msra.mxu1 %v196_v29 }
  0x36   :  { %v260_v31 = vld [vmem:[#allocation5 + $0x500] sm:$0xff]  ;;  %573 = vmatpush.msra.mxu3 %v324_v30  ;;  %v137_v30 = vld [vmem:[#allocation5 + $0x128] sm:$0xff] }
  0x37   :  { %v128_v32 = vld [vmem:[#allocation5 + $0xe0] sm:$0xff]  ;;  %553 = vmatpush.msra.mxu2 %v260_v31  ;;  %v209_v31 = vld [vmem:[#allocation5 + $0x368] sm:$0xff] }
  0x38   :  { %v192_v33 = vld [vmem:[#allocation5 + $0x2e0] sm:$0xff]  ;;  %514 = vmatpush.msra.mxu0 %v128_v32 }
  0x39   :  { %v320_v34 = vld [vmem:[#allocation5 + $0x6e0] sm:$0xff]  ;;  %534 = vmatpush.msra.mxu1 %v192_v33 }
  0x3a   :  { %v256_v35 = vld [vmem:[#allocation5 + $0x4e0] sm:$0xff]  ;;  %574 = vmatpush.msra.mxu3 %v320_v34  ;;  %v133_v34 = vld [vmem:[#allocation5 + $0x108] sm:$0xff] }
  0x3b   :  { %v124_v36 = vld [vmem:[#allocation5 + $0xc0] sm:$0xff]  ;;  %554 = vmatpush.msra.mxu2 %v256_v35  ;;  %v205_v35 = vld [vmem:[#allocation5 + $0x348] sm:$0xff] }
  0x3c   :  { %v188_v37 = vld [vmem:[#allocation5 + $0x2c0] sm:$0xff]  ;;  %515 = vmatpush.msra.mxu0 %v124_v36 }
  0x3d   :  { %v316_v38 = vld [vmem:[#allocation5 + $0x6c0] sm:$0xff]  ;;  %535 = vmatpush.msra.mxu1 %v188_v37 }
  0x3e   :  { %v252_v39 = vld [vmem:[#allocation5 + $0x4c0] sm:$0xff]  ;;  %575 = vmatpush.msra.mxu3 %v316_v38  ;;  %v129_v38 = vld [vmem:[#allocation5 + $0xe8] sm:$0xff] }
  0x3f   :  { %v120_v40 = vld [vmem:[#allocation5 + $0xa0] sm:$0xff]  ;;  %555 = vmatpush.msra.mxu2 %v252_v39  ;;  %v201_v39 = vld [vmem:[#allocation5 + $0x328] sm:$0xff] }
  0x40   :  { %v184_v41 = vld [vmem:[#allocation5 + $0x2a0] sm:$0xff]  ;;  %516 = vmatpush.msra.mxu0 %v120_v40 }
  0x41   :  { %v312_v42 = vld [vmem:[#allocation5 + $0x6a0] sm:$0xff]  ;;  %536 = vmatpush.msra.mxu1 %v184_v41 }
  0x42   :  { %v248_v43 = vld [vmem:[#allocation5 + $0x4a0] sm:$0xff]  ;;  %576 = vmatpush.msra.mxu3 %v312_v42  ;;  %v125_v42 = vld [vmem:[#allocation5 + $0xc8] sm:$0xff] }
  0x43   :  { %v116_v44 = vld [vmem:[#allocation5 + $0x80] sm:$0xff]  ;;  %556 = vmatpush.msra.mxu2 %v248_v43  ;;  %v197_v43 = vld [vmem:[#allocation5 + $0x308] sm:$0xff] }
  0x44   :  { %v180_v45 = vld [vmem:[#allocation5 + $0x280] sm:$0xff]  ;;  %517 = vmatpush.msra.mxu0 %v116_v44 }
  0x45   :  { %v308_v46 = vld [vmem:[#allocation5 + $0x680] sm:$0xff]  ;;  %537 = vmatpush.msra.mxu1 %v180_v45 }
  0x46   :  { %v244_v47 = vld [vmem:[#allocation5 + $0x480] sm:$0xff]  ;;  %577 = vmatpush.msra.mxu3 %v308_v46  ;;  %v121_v46 = vld [vmem:[#allocation5 + $0xa8] sm:$0xff] }
  0x47   :  { %v112_v48 = vld [vmem:[#allocation5 + $0x60] sm:$0xff]  ;;  %557 = vmatpush.msra.mxu2 %v244_v47  ;;  %v193_v47 = vld [vmem:[#allocation5 + $0x2e8] sm:$0xff] }
  0x48   :  { %v176_v49 = vld [vmem:[#allocation5 + $0x260] sm:$0xff]  ;;  %518 = vmatpush.msra.mxu0 %v112_v48 }
  0x49   :  { %v304_v50 = vld [vmem:[#allocation5 + $0x660] sm:$0xff]  ;;  %538 = vmatpush.msra.mxu1 %v176_v49 }
  0x4a   :  { %v240_v51 = vld [vmem:[#allocation5 + $0x460] sm:$0xff]  ;;  %578 = vmatpush.msra.mxu3 %v304_v50  ;;  %v117_v50 = vld [vmem:[#allocation5 + $0x88] sm:$0xff] }
  0x4b   :  { %v108_v52 = vld [vmem:[#allocation5 + $0x40] sm:$0xff]  ;;  %558 = vmatpush.msra.mxu2 %v240_v51  ;;  %v189_v51 = vld [vmem:[#allocation5 + $0x2c8] sm:$0xff] }
  0x4c   :  { %v172_v53 = vld [vmem:[#allocation5 + $0x240] sm:$0xff]  ;;  %519 = vmatpush.msra.mxu0 %v108_v52 }
  0x4d   :  { %v300_v54 = vld [vmem:[#allocation5 + $0x640] sm:$0xff]  ;;  %539 = vmatpush.msra.mxu1 %v172_v53 }
  0x4e   :  { %v236_v55 = vld [vmem:[#allocation5 + $0x440] sm:$0xff]  ;;  %579 = vmatpush.msra.mxu3 %v300_v54  ;;  %v113_v54 = vld [vmem:[#allocation5 + $0x68] sm:$0xff] }
  0x4f   :  { %v104_v56 = vld [vmem:[#allocation5 + $0x20] sm:$0xff]  ;;  %559 = vmatpush.msra.mxu2 %v236_v55  ;;  %v185_v55 = vld [vmem:[#allocation5 + $0x2a8] sm:$0xff] }
  0x50   :  { %v168_v57 = vld [vmem:[#allocation5 + $0x220] sm:$0xff]  ;;  %520 = vmatpush.msra.mxu0 %v104_v56 }
  0x51   :  { %v296_v58 = vld [vmem:[#allocation5 + $0x620] sm:$0xff]  ;;  %540 = vmatpush.msra.mxu1 %v168_v57 }
  0x52   :  { %v232_v59 = vld [vmem:[#allocation5 + $0x420] sm:$0xff]  ;;  %580 = vmatpush.msra.mxu3 %v296_v58  ;;  %v109_v58 = vld [vmem:[#allocation5 + $0x48] sm:$0xff] }
  0x53   :  { %v100_v60 = vld [vmem:[#allocation5] sm:$0xff]  ;;  %560 = vmatpush.msra.mxu2 %v232_v59  ;;  %v181_v59 = vld [vmem:[#allocation5 + $0x288] sm:$0xff] }
  0x54   :  { %v164_v61 = vld [vmem:[#allocation5 + $0x200] sm:$0xff]  ;;  %521 = vmatpush.msra.mxu0 %v100_v60 }
  0x55   :  { %v292_v62 = vld [vmem:[#allocation5 + $0x600] sm:$0xff]  ;;  %541 = vmatpush.msra.mxu1 %v164_v61  ;;  %522 = vmatmul.f32.vlgmr.msra.gmra.mxu0 %v1504_v16 }
  0x56   :  { %v416_v63 = vld [vmem:[#allocation5 + $0x9e0] sm:$0xff]  ;;  %581 = vmatpush.msra.mxu3 %v292_v62  ;;  %542 = vmatmul.f32.vlgmr.msra.gmra.mxu1 %v1510_v22  ;;  %v105_v62 = vld [vmem:[#allocation5 + $0x28] sm:$0xff] }
  0x57   :  { %v480_v0 = vld [vmem:[#allocation5 + $0xbe0] sm:$0xff]  ;;  %586 = vmatpush.msrb.mxu0 %v416_v63  ;;  %v1513_v63 = vld [vmem:[#allocation2 + $0x30] sm:$0xff] }
  0x58   :  { %v228_v2 = vld [vmem:[#allocation5 + $0x400] sm:$0xff]  ;;  %606 = vmatpush.msrb.mxu1 %v480_v0  ;;  %646 = vmatpush.msrb.mxu3 %v161_v1  ;;  %v177_v0 = vld [vmem:[#allocation5 + $0x268] sm:$0xff] }
  0x59   :  { %v412_v3 = vld [vmem:[#allocation5 + $0x9c0] sm:$0xff]  ;;  %561 = vmatpush.msra.mxu2 %v228_v2 }
  0x5a   :  { %v476_v4 = vld [vmem:[#allocation5 + $0xbc0] sm:$0xff]  ;;  %587 = vmatpush.msrb.mxu0 %v412_v3  ;;  %647 = vmatpush.msrb.mxu3 %v157_v6  ;;  %v101_v3 = vld [vmem:[#allocation5 + $0x8] sm:$0xff] }
  0x5b   :  { %v488_v5 = vld [vmem:[#allocation5 + $0xc20] sm:$0xff]  ;;  %607 = vmatpush.msrb.mxu1 %v476_v4  ;;  %562 = vmatmul.f32.vlgmr.msra.gmra.mxu2 %v1501_v11  ;;  %v1517_v4 = vld [vmem:[#allocation2 + $0x20] sm:$0xff] }
  0x5c   :  { %v408_v7 = vld [vmem:[#allocation5 + $0x9a0] sm:$0xff]  ;;  %640 = vmatpush.msrb.mxu2 %v488_v5  ;;  %648 = vmatpush.msrb.mxu3 %v153_v10  ;;  %v173_v5 = vld [vmem:[#allocation5 + $0x248] sm:$0xff] }
  0x5d   :  { %v472_v8 = vld [vmem:[#allocation5 + $0xba0] sm:$0xff]  ;;  %588 = vmatpush.msrb.mxu0 %v408_v7  ;;  %v353_v6 = vld [vmem:[#allocation5 + $0x7e8] sm:$0xff] }
  0x5e   :  { %v484_v9 = vld [vmem:[#allocation5 + $0xc00] sm:$0xff]  ;;  %608 = vmatpush.msrb.mxu1 %v472_v8  ;;  %649 = vmatpush.msrb.mxu3 %v149_v15  ;;  %v417_v7 = vld [vmem:[#allocation5 + $0x9e8] sm:$0xff]  ;;  %v1519_v8 = vld [vmem:[#allocation2 + $0x28] sm:$0xff] }
  0x5f   :  { %v404_v13 = vld [vmem:[#allocation5 + $0x980] sm:$0xff]  ;;  %641 = vmatpush.msrb.mxu2 %v484_v9  ;;  %v169_v9 = vld [vmem:[#allocation5 + $0x228] sm:$0xff] }
  0x60   :  { %v468_v14 = vld [vmem:[#allocation5 + $0xb80] sm:$0xff]  ;;  %589 = vmatpush.msrb.mxu0 %v404_v13  ;;  %650 = vmatpush.msrb.mxu3 %v145_v21  ;;  %v349_v10 = vld [vmem:[#allocation5 + $0x7c8] sm:$0xff] }
  0x61   :  { %v1506_v17 = vld [vmem:[#allocation2 + $0x18] sm:$0xff]  ;;  %666 = vmatpush.msra.mxu2 %v225_v12  ;;  %609 = vmatpush.msrb.mxu1 %v468_v14  ;;  %v413_v12 = vld [vmem:[#allocation5 + $0x9c8] sm:$0xff] }
  0x62   :  { %v400_v19 = vld [vmem:[#allocation5 + $0x960] sm:$0xff]  ;;  %582 = vmatmul.f32.vlgmr.msra.gmra.mxu3 %v1506_v17  ;;  %v165_v13 = vld [vmem:[#allocation5 + $0x208] sm:$0xff] }
  0x63   :  { %v464_v20 = vld [vmem:[#allocation5 + $0xb60] sm:$0xff]  ;;  %667 = vmatpush.msra.mxu2 %v221_v18  ;;  %590 = vmatpush.msrb.mxu0 %v400_v19  ;;  %v289_v14 = vld [vmem:[#allocation5 + $0x5e8] sm:$0xff] }
  0x64   :  { %v396_v24 = vld [vmem:[#allocation5 + $0x940] sm:$0xff]  ;;  %610 = vmatpush.msrb.mxu1 %v464_v20  ;;  %651 = vmatpush.msrb.mxu3 %v141_v26  ;;  %v345_v15 = vld [vmem:[#allocation5 + $0x7a8] sm:$0xff] }
  0x65   :  { %v460_v25 = vld [vmem:[#allocation5 + $0xb40] sm:$0xff]  ;;  %668 = vmatpush.msra.mxu2 %v217_v23  ;;  %591 = vmatpush.msrb.mxu0 %v396_v24  ;;  %v409_v18 = vld [vmem:[#allocation5 + $0x9a8] sm:$0xff] }
  0x66   :  { %v392_v28 = vld [vmem:[#allocation5 + $0x920] sm:$0xff]  ;;  %611 = vmatpush.msrb.mxu1 %v460_v25  ;;  %652 = vmatpush.msrb.mxu3 %v137_v30  ;;  %v481_v19 = vld [vmem:[#allocation5 + $0xbe8] sm:$0xff] }
  0x67   :  { %v456_v29 = vld [vmem:[#allocation5 + $0xb20] sm:$0xff]  ;;  %669 = vmatpush.msra.mxu2 %v213_v27  ;;  %592 = vmatpush.msrb.mxu0 %v392_v28  ;;  %v285_v20 = vld [vmem:[#allocation5 + $0x5c8] sm:$0xff] }
  0x68   :  { %v388_v32 = vld [vmem:[#allocation5 + $0x900] sm:$0xff]  ;;  %612 = vmatpush.msrb.mxu1 %v456_v29  ;;  %653 = vmatpush.msrb.mxu3 %v133_v34  ;;  %v341_v21 = vld [vmem:[#allocation5 + $0x788] sm:$0xff] }
  0x69   :  { %v452_v33 = vld [vmem:[#allocation5 + $0xb00] sm:$0xff]  ;;  %670 = vmatpush.msra.mxu2 %v209_v31  ;;  %593 = vmatpush.msrb.mxu0 %v388_v32  ;;  %v405_v23 = vld [vmem:[#allocation5 + $0x988] sm:$0xff] }
  0x6a   :  { %v384_v36 = vld [vmem:[#allocation5 + $0x8e0] sm:$0xff]  ;;  %613 = vmatpush.msrb.mxu1 %v452_v33  ;;  %654 = vmatpush.msrb.mxu3 %v129_v38  ;;  %v477_v24 = vld [vmem:[#allocation5 + $0xbc8] sm:$0xff] }
  0x6b   :  { %v448_v37 = vld [vmem:[#allocation5 + $0xae0] sm:$0xff]  ;;  %671 = vmatpush.msra.mxu2 %v205_v35  ;;  %594 = vmatpush.msrb.mxu0 %v384_v36  ;;  %v281_v25 = vld [vmem:[#allocation5 + $0x5a8] sm:$0xff] }
  0x6c   :  { %v380_v40 = vld [vmem:[#allocation5 + $0x8c0] sm:$0xff]  ;;  %614 = vmatpush.msrb.mxu1 %v448_v37  ;;  %655 = vmatpush.msrb.mxu3 %v125_v42  ;;  %v337_v26 = vld [vmem:[#allocation5 + $0x768] sm:$0xff] }
  0x6d   :  { %v444_v41 = vld [vmem:[#allocation5 + $0xac0] sm:$0xff]  ;;  %672 = vmatpush.msra.mxu2 %v201_v39  ;;  %595 = vmatpush.msrb.mxu0 %v380_v40  ;;  %v401_v27 = vld [vmem:[#allocation5 + $0x968] sm:$0xff] }
  0x6e   :  { %v376_v44 = vld [vmem:[#allocation5 + $0x8a0] sm:$0xff]  ;;  %615 = vmatpush.msrb.mxu1 %v444_v41  ;;  %656 = vmatpush.msrb.mxu3 %v121_v46  ;;  %v473_v28 = vld [vmem:[#allocation5 + $0xba8] sm:$0xff] }
  0x6f   :  { %v440_v45 = vld [vmem:[#allocation5 + $0xaa0] sm:$0xff]  ;;  %673 = vmatpush.msra.mxu2 %v197_v43  ;;  %596 = vmatpush.msrb.mxu0 %v376_v44  ;;  %v277_v29 = vld [vmem:[#allocation5 + $0x588] sm:$0xff] }
  0x70   :  { %v372_v48 = vld [vmem:[#allocation5 + $0x880] sm:$0xff]  ;;  %616 = vmatpush.msrb.mxu1 %v440_v45  ;;  %657 = vmatpush.msrb.mxu3 %v117_v50  ;;  %v333_v30 = vld [vmem:[#allocation5 + $0x748] sm:$0xff] }
  0x71   :  { %v436_v49 = vld [vmem:[#allocation5 + $0xa80] sm:$0xff]  ;;  %674 = vmatpush.msra.mxu2 %v193_v47  ;;  %597 = vmatpush.msrb.mxu0 %v372_v48  ;;  %v397_v31 = vld [vmem:[#allocation5 + $0x948] sm:$0xff] }
  0x72   :  { %v368_v52 = vld [vmem:[#allocation5 + $0x860] sm:$0xff]  ;;  %617 = vmatpush.msrb.mxu1 %v436_v49  ;;  %658 = vmatpush.msrb.mxu3 %v113_v54  ;;  %v469_v32 = vld [vmem:[#allocation5 + $0xb88] sm:$0xff] }
  0x73   :  { %v432_v53 = vld [vmem:[#allocation5 + $0xa60] sm:$0xff]  ;;  %675 = vmatpush.msra.mxu2 %v189_v51  ;;  %598 = vmatpush.msrb.mxu0 %v368_v52  ;;  %v273_v33 = vld [vmem:[#allocation5 + $0x568] sm:$0xff] }
  0x74   :  { %v364_v56 = vld [vmem:[#allocation5 + $0x840] sm:$0xff]  ;;  %618 = vmatpush.msrb.mxu1 %v432_v53  ;;  %659 = vmatpush.msrb.mxu3 %v109_v58  ;;  %v329_v34 = vld [vmem:[#allocation5 + $0x728] sm:$0xff] }
  0x75   :  { %v428_v57 = vld [vmem:[#allocation5 + $0xa40] sm:$0xff]  ;;  %676 = vmatpush.msra.mxu2 %v185_v55  ;;  %599 = vmatpush.msrb.mxu0 %v364_v56  ;;  %v393_v35 = vld [vmem:[#allocation5 + $0x928] sm:$0xff] }
  0x76   :  { %v360_v60 = vld [vmem:[#allocation5 + $0x820] sm:$0xff]  ;;  %619 = vmatpush.msrb.mxu1 %v428_v57  ;;  %660 = vmatpush.msrb.mxu3 %v105_v62  ;;  %v465_v36 = vld [vmem:[#allocation5 + $0xb68] sm:$0xff] }
  0x77   :  { %v424_v61 = vld [vmem:[#allocation5 + $0xa20] sm:$0xff]  ;;  %677 = vmatpush.msra.mxu2 %v181_v59  ;;  %600 = vmatpush.msrb.mxu0 %v360_v60  ;;  %v269_v37 = vld [vmem:[#allocation5 + $0x548] sm:$0xff] }
  0x78   :  { %v356_v1 = vld [vmem:[#allocation5 + $0x800] sm:$0xff]  ;;  %620 = vmatpush.msrb.mxu1 %v424_v61  ;;  %1260 = vmatmul.msk.f32.vlgmr.msrb.gmra.mxu2 %vm502_vm0, %v1513_v63  ;;  %v325_v38 = vld [vmem:[#allocation5 + $0x708] sm:$0xff] }
  0x79   :  { %v420_v2 = vld [vmem:[#allocation5 + $0xa00] sm:$0xff]  ;;  %678 = vmatpush.msra.mxu2 %v177_v0  ;;  %601 = vmatpush.msrb.mxu0 %v356_v1  ;;  %v389_v39 = vld [vmem:[#allocation5 + $0x908] sm:$0xff] }
  0x7a   :  { %621 = vmatpush.msrb.mxu1 %v420_v2  ;;  %661 = vmatpush.msrb.mxu3 %v101_v3  ;;  %v461_v40 = vld [vmem:[#allocation5 + $0xb48] sm:$0xff] }
  0x7b   :  { %602 = vmatmul.f32.vlgmr.msrb.gmra.mxu0 %v1517_v4  ;;  %679 = vmatpush.msra.mxu2 %v173_v5  ;;  %v265_v41 = vld [vmem:[#allocation5 + $0x528] sm:$0xff] }
  0x7c   :  { %706 = vmatpush.msra.mxu1 %v353_v6  ;;  %726 = vmatpush.msra.mxu3 %v417_v7  ;;  %v321_v42 = vld [vmem:[#allocation5 + $0x6e8] sm:$0xff] }
  0x7d   :  { %622 = vmatmul.f32.vlgmr.msrb.gmra.mxu1 %v1519_v8  ;;  %680 = vmatpush.msra.mxu2 %v169_v9  ;;  %v385_v43 = vld [vmem:[#allocation5 + $0x8e8] sm:$0xff] }
  0x7e   :  { %707 = vmatpush.msra.mxu1 %v349_v10  ;;  %727 = vmatpush.msra.mxu3 %v413_v12  ;;  %v457_v44 = vld [vmem:[#allocation5 + $0xb28] sm:$0xff] }
  0x7f   :  { %681 = vmatpush.msra.mxu2 %v165_v13  ;;  %686 = vmatpush.msra.mxu0 %v289_v14  ;;  %v261_v45 = vld [vmem:[#allocation5 + $0x508] sm:$0xff]  ;;  %v162_v14 = vld [vmem:[#allocation5 + $0x1f0] sm:$0xff] }
  0x80   :  { %708 = vmatpush.msra.mxu1 %v345_v15  ;;  %728 = vmatpush.msra.mxu3 %v409_v18  ;;  %v317_v46 = vld [vmem:[#allocation5 + $0x6c8] sm:$0xff] }
  0x81   :  { %746 = vmatpush.msrb.mxu2 %v481_v19  ;;  %687 = vmatpush.msra.mxu0 %v285_v20  ;;  %v381_v47 = vld [vmem:[#allocation5 + $0x8c8] sm:$0xff]  ;;  %v158_v20 = vld [vmem:[#allocation5 + $0x1d0] sm:$0xff] }
  0x82   :  { %709 = vmatpush.msra.mxu1 %v341_v21  ;;  %729 = vmatpush.msra.mxu3 %v405_v23  ;;  %v453_v48 = vld [vmem:[#allocation5 + $0xb08] sm:$0xff]  ;;  %v226_v21 = vld [vmem:[#allocation5 + $0x3f0] sm:$0xff] }
  0x83   :  { %747 = vmatpush.msrb.mxu2 %v477_v24  ;;  %688 = vmatpush.msra.mxu0 %v281_v25  ;;  %v257_v49 = vld [vmem:[#allocation5 + $0x4e8] sm:$0xff]  ;;  %v154_v25 = vld [vmem:[#allocation5 + $0x1b0] sm:$0xff] }
  0x84   :  { %710 = vmatpush.msra.mxu1 %v337_v26  ;;  %730 = vmatpush.msra.mxu3 %v401_v27  ;;  %v313_v50 = vld [vmem:[#allocation5 + $0x6a8] sm:$0xff]  ;;  %v222_v26 = vld [vmem:[#allocation5 + $0x3d0] sm:$0xff] }
  0x85   :  { %748 = vmatpush.msrb.mxu2 %v473_v28  ;;  %689 = vmatpush.msra.mxu0 %v277_v29  ;;  %v377_v51 = vld [vmem:[#allocation5 + $0x8a8] sm:$0xff]  ;;  %v354_v27 = vld [vmem:[#allocation5 + $0x7f0] sm:$0xff] }
  0x86   :  { %711 = vmatpush.msra.mxu1 %v333_v30  ;;  %731 = vmatpush.msra.mxu3 %v397_v31  ;;  %v449_v52 = vld [vmem:[#allocation5 + $0xae8] sm:$0xff]  ;;  %v150_v28 = vld [vmem:[#allocation5 + $0x190] sm:$0xff] }
  0x87   :  { %749 = vmatpush.msrb.mxu2 %v469_v32  ;;  %690 = vmatpush.msra.mxu0 %v273_v33  ;;  %v309_v53 = vld [vmem:[#allocation5 + $0x688] sm:$0xff]  ;;  %v218_v29 = vld [vmem:[#allocation5 + $0x3b0] sm:$0xff] }
  0x88   :  { %712 = vmatpush.msra.mxu1 %v329_v34  ;;  %732 = vmatpush.msra.mxu3 %v393_v35  ;;  %v373_v54 = vld [vmem:[#allocation5 + $0x888] sm:$0xff]  ;;  %v350_v30 = vld [vmem:[#allocation5 + $0x7d0] sm:$0xff] }
  0x89   :  { %750 = vmatpush.msrb.mxu2 %v465_v36  ;;  %691 = vmatpush.msra.mxu0 %v269_v37  ;;  %v253_v55 = vld [vmem:[#allocation5 + $0x4c8] sm:$0xff]  ;;  %v146_v31 = vld [vmem:[#allocation5 + $0x170] sm:$0xff] }
  0x8a   :  { %713 = vmatpush.msra.mxu1 %v325_v38  ;;  %733 = vmatpush.msra.mxu3 %v389_v39  ;;  %v445_v56 = vld [vmem:[#allocation5 + $0xac8] sm:$0xff]  ;;  %v214_v32 = vld [vmem:[#allocation5 + $0x390] sm:$0xff] }
  0x8b   :  { %751 = vmatpush.msrb.mxu2 %v461_v40  ;;  %692 = vmatpush.msra.mxu0 %v265_v41  ;;  %v305_v57 = vld [vmem:[#allocation5 + $0x668] sm:$0xff]  ;;  %v290_v33 = vld [vmem:[#allocation5 + $0x5f0] sm:$0xff] }
  0x8c   :  { %714 = vmatpush.msra.mxu1 %v321_v42  ;;  %734 = vmatpush.msra.mxu3 %v385_v43  ;;  %v369_v58 = vld [vmem:[#allocation5 + $0x868] sm:$0xff]  ;;  %v346_v34 = vld [vmem:[#allocation5 + $0x7b0] sm:$0xff] }
  0x8d   :  { %752 = vmatpush.msrb.mxu2 %v457_v44  ;;  %693 = vmatpush.msra.mxu0 %v261_v45  ;;  %v249_v59 = vld [vmem:[#allocation5 + $0x4a8] sm:$0xff]  ;;  %v142_v35 = vld [vmem:[#allocation5 + $0x150] sm:$0xff] }
  0x8e   :  { %715 = vmatpush.msra.mxu1 %v317_v46  ;;  %735 = vmatpush.msra.mxu3 %v381_v47  ;;  %v441_v60 = vld [vmem:[#allocation5 + $0xaa8] sm:$0xff]  ;;  %v210_v36 = vld [vmem:[#allocation5 + $0x370] sm:$0xff] }
  0x8f   :  { %753 = vmatpush.msrb.mxu2 %v453_v48  ;;  %694 = vmatpush.msra.mxu0 %v257_v49  ;;  %v301_v61 = vld [vmem:[#allocation5 + $0x648] sm:$0xff]  ;;  %v286_v37 = vld [vmem:[#allocation5 + $0x5d0] sm:$0xff] }
  0x90   :  { %716 = vmatpush.msra.mxu1 %v313_v50  ;;  %736 = vmatpush.msra.mxu3 %v377_v51  ;;  %v365_v62 = vld [vmem:[#allocation5 + $0x848] sm:$0xff]  ;;  %v342_v38 = vld [vmem:[#allocation5 + $0x790] sm:$0xff] }
  0x91   :  { %754 = vmatpush.msrb.mxu2 %v449_v52  ;;  %662 = vmatmul.f32.vlgmr.msrb.gmra.mxu3 %v1504_v16  ;;  %v245_v0 = vld [vmem:[#allocation5 + $0x488] sm:$0xff]  ;;  %v138_v39 = vld [vmem:[#allocation5 + $0x130] sm:$0xff] }
  0x92   :  { %717 = vmatpush.msra.mxu1 %v309_v53  ;;  %737 = vmatpush.msra.mxu3 %v373_v54  ;;  %v437_v1 = vld [vmem:[#allocation5 + $0xa88] sm:$0xff]  ;;  %v206_v40 = vld [vmem:[#allocation5 + $0x350] sm:$0xff] }
  0x93   :  { %695 = vmatpush.msra.mxu0 %v253_v55  ;;  %755 = vmatpush.msrb.mxu2 %v445_v56  ;;  %v297_v2 = vld [vmem:[#allocation5 + $0x628] sm:$0xff]  ;;  %v282_v41 = vld [vmem:[#allocation5 + $0x5b0] sm:$0xff] }
  0x94   :  { %718 = vmatpush.msra.mxu1 %v305_v57  ;;  %738 = vmatpush.msra.mxu3 %v369_v58  ;;  %v361_v3 = vld [vmem:[#allocation5 + $0x828] sm:$0xff]  ;;  %v338_v42 = vld [vmem:[#allocation5 + $0x770] sm:$0xff] }
  0x95   :  { %696 = vmatpush.msra.mxu0 %v249_v59  ;;  %756 = vmatpush.msrb.mxu2 %v441_v60  ;;  %v241_v5 = vld [vmem:[#allocation5 + $0x468] sm:$0xff]  ;;  %v134_v43 = vld [vmem:[#allocation5 + $0x110] sm:$0xff] }
  0x96   :  { %719 = vmatpush.msra.mxu1 %v301_v61  ;;  %739 = vmatpush.msra.mxu3 %v365_v62  ;;  %v433_v6 = vld [vmem:[#allocation5 + $0xa68] sm:$0xff]  ;;  %v202_v44 = vld [vmem:[#allocation5 + $0x330] sm:$0xff] }
  0x97   :  { %697 = vmatpush.msra.mxu0 %v245_v0  ;;  %757 = vmatpush.msrb.mxu2 %v437_v1  ;;  %v293_v7 = vld [vmem:[#allocation5 + $0x608] sm:$0xff]  ;;  %v278_v45 = vld [vmem:[#allocation5 + $0x590] sm:$0xff] }
  0x98   :  { %682 = vmatmul.f32.vlgmr.msra.gmra.mxu2 %v1510_v22  ;;  %720 = vmatpush.msra.mxu1 %v297_v2  ;;  %v357_v9 = vld [vmem:[#allocation5 + $0x808] sm:$0xff]  ;;  %v334_v46 = vld [vmem:[#allocation5 + $0x750] sm:$0xff] }
  0x99   :  { %v237_v10 = vld [vmem:[#allocation5 + $0x448] sm:$0xff]  ;;  %740 = vmatpush.msra.mxu3 %v361_v3  ;;  %698 = vmatpush.msra.mxu0 %v241_v5  ;;  %v130_v47 = vld [vmem:[#allocation5 + $0xf0] sm:$0xff] }
  0x9a   :  { %v429_v12 = vld [vmem:[#allocation5 + $0xa48] sm:$0xff]  ;;  %758 = vmatpush.msrb.mxu2 %v433_v6  ;;  %721 = vmatpush.msra.mxu1 %v293_v7  ;;  %v198_v48 = vld [vmem:[#allocation5 + $0x310] sm:$0xff] }
  0x9b   :  { %v489_v13 = vld [vmem:[#allocation5 + $0xc28] sm:$0xff]  ;;  %741 = vmatpush.msra.mxu3 %v357_v9  ;;  %699 = vmatpush.msra.mxu0 %v237_v10  ;;  %v274_v49 = vld [vmem:[#allocation5 + $0x570] sm:$0xff] }
  0x9c   :  { %v233_v15 = vld [vmem:[#allocation5 + $0x428] sm:$0xff]  ;;  %742 = vmatmul.f32.vlgmr.msra.gmra.mxu3 %v1517_v4  ;;  %759 = vmatpush.msrb.mxu2 %v429_v12  ;;  %v330_v50 = vld [vmem:[#allocation5 + $0x730] sm:$0xff] }
  0x9d   :  { %v425_v18 = vld [vmem:[#allocation5 + $0xa28] sm:$0xff]  ;;  %780 = vmatpush.msrb.mxu3 %v489_v13  ;;  %786 = vmatpush.msrb.mxu1 %v162_v14  ;;  %v126_v51 = vld [vmem:[#allocation5 + $0xd0] sm:$0xff] }
  0x9e   :  { %v485_v19 = vld [vmem:[#allocation5 + $0xc08] sm:$0xff]  ;;  %700 = vmatpush.msra.mxu0 %v233_v15  ;;  %760 = vmatpush.msrb.mxu2 %v425_v18  ;;  %v194_v52 = vld [vmem:[#allocation5 + $0x2f0] sm:$0xff] }
  0x9f   :  { %v229_v23 = vld [vmem:[#allocation5 + $0x408] sm:$0xff]  ;;  %781 = vmatpush.msrb.mxu3 %v485_v19  ;;  %787 = vmatpush.msrb.mxu1 %v158_v20  ;;  %v270_v53 = vld [vmem:[#allocation5 + $0x550] sm:$0xff] }
  0xa0   :  { %v421_v24 = vld [vmem:[#allocation5 + $0xa08] sm:$0xff]  ;;  %701 = vmatpush.msra.mxu0 %v229_v23  ;;  %722 = vmatmul.f32.vlgmr.msra.gmra.mxu1 %v1506_v17  ;;  %v326_v54 = vld [vmem:[#allocation5 + $0x710] sm:$0xff] }
  0xa1   :  { %806 = vmatpush.msra.mxu3 %v226_v21  ;;  %761 = vmatpush.msrb.mxu2 %v421_v24  ;;  %v122_v55 = vld [vmem:[#allocation5 + $0xb0] sm:$0xff] }
  0xa2   :  { %788 = vmatpush.msrb.mxu1 %v154_v25  ;;  %702 = vmatmul.f32.vlgmr.msra.gmra.mxu0 %v1501_v11  ;;  %v190_v56 = vld [vmem:[#allocation5 + $0x2d0] sm:$0xff] }
  0xa3   :  { %762 = vmatmul.f32.vlgmr.msrb.gmra.mxu2 %v1519_v8  ;;  %807 = vmatpush.msra.mxu3 %v222_v26  ;;  %v266_v57 = vld [vmem:[#allocation5 + $0x530] sm:$0xff] }
  0xa4   :  { %846 = vmatpush.msra.mxu2 %v354_v27  ;;  %789 = vmatpush.msrb.mxu1 %v150_v28  ;;  %v322_v58 = vld [vmem:[#allocation5 + $0x6f0] sm:$0xff] }
  0xa5   :  { %1261 = vmatmul.msk.f32.vlgmr.msrb.gmra.mxu3 %vm502_vm0, %v1513_v63  ;;  %826 = vmatpush.msrb.mxu0 %v290_v33  ;;  %v118_v59 = vld [vmem:[#allocation5 + $0x90] sm:$0xff] }
  0xa6   :  { %808 = vmatpush.msra.mxu3 %v218_v29  ;;  %847 = vmatpush.msra.mxu2 %v350_v30  ;;  %v186_v60 = vld [vmem:[#allocation5 + $0x2b0] sm:$0xff] }
  0xa7   :  { %790 = vmatpush.msrb.mxu1 %v146_v31  ;;  %827 = vmatpush.msrb.mxu0 %v286_v37  ;;  %v262_v61 = vld [vmem:[#allocation5 + $0x510] sm:$0xff] }
  0xa8   :  { %809 = vmatpush.msra.mxu3 %v214_v32  ;;  %848 = vmatpush.msra.mxu2 %v346_v34  ;;  %v318_v62 = vld [vmem:[#allocation5 + $0x6d0] sm:$0xff]  ;;  %v163_v32 = vld [vmem:[#allocation5 + $0x1f8] sm:$0xff] }
  0xa9   :  { %791 = vmatpush.msrb.mxu1 %v142_v35  ;;  %828 = vmatpush.msrb.mxu0 %v282_v41  ;;  %v114_v0 = vld [vmem:[#allocation5 + $0x70] sm:$0xff] }
  0xaa   :  { %810 = vmatpush.msra.mxu3 %v210_v36  ;;  %849 = vmatpush.msra.mxu2 %v342_v38  ;;  %v182_v1 = vld [vmem:[#allocation5 + $0x290] sm:$0xff]  ;;  %v159_v36 = vld [vmem:[#allocation5 + $0x1d8] sm:$0xff] }
  0xab   :  { %792 = vmatpush.msrb.mxu1 %v138_v39  ;;  %829 = vmatpush.msrb.mxu0 %v278_v45  ;;  %v258_v2 = vld [vmem:[#allocation5 + $0x4f0] sm:$0xff] }
  0xac   :  { %811 = vmatpush.msra.mxu3 %v206_v40  ;;  %850 = vmatpush.msra.mxu2 %v338_v42  ;;  %v314_v3 = vld [vmem:[#allocation5 + $0x6b0] sm:$0xff]  ;;  %v155_v40 = vld [vmem:[#allocation5 + $0x1b8] sm:$0xff] }
  0xad   :  { %793 = vmatpush.msrb.mxu1 %v134_v43  ;;  %830 = vmatpush.msrb.mxu0 %v274_v49  ;;  %v110_v5 = vld [vmem:[#allocation5 + $0x50] sm:$0xff]  ;;  %v151_v43 = vld [vmem:[#allocation5 + $0x198] sm:$0xff] }
  0xae   :  { %812 = vmatpush.msra.mxu3 %v202_v44  ;;  %851 = vmatpush.msra.mxu2 %v334_v46  ;;  %v178_v6 = vld [vmem:[#allocation5 + $0x270] sm:$0xff] }
  0xaf   :  { %794 = vmatpush.msrb.mxu1 %v130_v47  ;;  %831 = vmatpush.msrb.mxu0 %v270_v53  ;;  %v254_v7 = vld [vmem:[#allocation5 + $0x4d0] sm:$0xff]  ;;  %v147_v47 = vld [vmem:[#allocation5 + $0x178] sm:$0xff] }
  0xb0   :  { %813 = vmatpush.msra.mxu3 %v198_v48  ;;  %852 = vmatpush.msra.mxu2 %v330_v50  ;;  %v310_v9 = vld [vmem:[#allocation5 + $0x690] sm:$0xff]  ;;  %v227_v48 = vld [vmem:[#allocation5 + $0x3f8] sm:$0xff] }
  0xb1   :  { %795 = vmatpush.msrb.mxu1 %v126_v51  ;;  %832 = vmatpush.msrb.mxu0 %v266_v57  ;;  %v106_v10 = vld [vmem:[#allocation5 + $0x30] sm:$0xff]  ;;  %v143_v50 = vld [vmem:[#allocation5 + $0x158] sm:$0xff] }
  0xb2   :  { %814 = vmatpush.msra.mxu3 %v194_v52  ;;  %853 = vmatpush.msra.mxu2 %v326_v54  ;;  %v174_v12 = vld [vmem:[#allocation5 + $0x250] sm:$0xff]  ;;  %v139_v53 = vld [vmem:[#allocation5 + $0x138] sm:$0xff] }
  0xb3   :  { %796 = vmatpush.msrb.mxu1 %v122_v55  ;;  %833 = vmatpush.msrb.mxu0 %v262_v61  ;;  %v250_v13 = vld [vmem:[#allocation5 + $0x4b0] sm:$0xff]  ;;  %v219_v54 = vld [vmem:[#allocation5 + $0x3b8] sm:$0xff] }
  0xb4   :  { %815 = vmatpush.msra.mxu3 %v190_v56  ;;  %854 = vmatpush.msra.mxu2 %v322_v58  ;;  %v306_v14 = vld [vmem:[#allocation5 + $0x670] sm:$0xff]  ;;  %v135_v57 = vld [vmem:[#allocation5 + $0x118] sm:$0xff] }
  0xb5   :  { %797 = vmatpush.msrb.mxu1 %v118_v59  ;;  %834 = vmatpush.msrb.mxu0 %v258_v2  ;;  %v102_v15 = vld [vmem:[#allocation5 + $0x10] sm:$0xff]  ;;  %v215_v58 = vld [vmem:[#allocation5 + $0x398] sm:$0xff] }
  0xb6   :  { %816 = vmatpush.msra.mxu3 %v186_v60  ;;  %855 = vmatpush.msra.mxu2 %v318_v62  ;;  %v170_v18 = vld [vmem:[#allocation5 + $0x230] sm:$0xff]  ;;  %v131_v60 = vld [vmem:[#allocation5 + $0xf8] sm:$0xff] }
  0xb7   :  { %798 = vmatpush.msrb.mxu1 %v114_v0  ;;  %835 = vmatpush.msrb.mxu0 %v254_v7  ;;  %v418_v19 = vld [vmem:[#allocation5 + $0x9f0] sm:$0xff]  ;;  %v211_v61 = vld [vmem:[#allocation5 + $0x378] sm:$0xff] }
  0xb8   :  { %817 = vmatpush.msra.mxu3 %v182_v1  ;;  %856 = vmatpush.msra.mxu2 %v314_v3  ;;  %v302_v20 = vld [vmem:[#allocation5 + $0x650] sm:$0xff]  ;;  %v127_v1 = vld [vmem:[#allocation5 + $0xd8] sm:$0xff] }
  0xb9   :  { %799 = vmatpush.msrb.mxu1 %v110_v5  ;;  %836 = vmatpush.msrb.mxu0 %v250_v13  ;;  %v246_v21 = vld [vmem:[#allocation5 + $0x490] sm:$0xff]  ;;  %v207_v2 = vld [vmem:[#allocation5 + $0x358] sm:$0xff] }
  0xba   :  { %818 = vmatpush.msra.mxu3 %v178_v6  ;;  %857 = vmatpush.msra.mxu2 %v310_v9  ;;  %v166_v23 = vld [vmem:[#allocation5 + $0x210] sm:$0xff]  ;;  %v123_v6 = vld [vmem:[#allocation5 + $0xb8] sm:$0xff] }
  0xbb   :  { %800 = vmatpush.msrb.mxu1 %v106_v10  ;;  %v414_v24 = vld [vmem:[#allocation5 + $0x9d0] sm:$0xff]  ;;  %837 = vmatpush.msrb.mxu0 %v246_v21  ;;  %v203_v7 = vld [vmem:[#allocation5 + $0x338] sm:$0xff] }
  0xbc   :  { %819 = vmatpush.msra.mxu3 %v174_v12  ;;  %858 = vmatpush.msra.mxu2 %v306_v14  ;;  %v298_v25 = vld [vmem:[#allocation5 + $0x630] sm:$0xff]  ;;  %v119_v12 = vld [vmem:[#allocation5 + $0x98] sm:$0xff] }
  0xbd   :  { %801 = vmatpush.msrb.mxu1 %v102_v15  ;;  %v242_v26 = vld [vmem:[#allocation5 + $0x470] sm:$0xff]  ;;  %v199_v13 = vld [vmem:[#allocation5 + $0x318] sm:$0xff] }
  0xbe   :  { %820 = vmatpush.msra.mxu3 %v170_v18  ;;  %859 = vmatpush.msra.mxu2 %v302_v20  ;;  %v482_v27 = vld [vmem:[#allocation5 + $0xbf0] sm:$0xff]  ;;  %v115_v18 = vld [vmem:[#allocation5 + $0x78] sm:$0xff] }
  0xbf   :  { %866 = vmatpush.msra.mxu1 %v418_v19  ;;  %v410_v28 = vld [vmem:[#allocation5 + $0x9b0] sm:$0xff]  ;;  %838 = vmatpush.msrb.mxu0 %v242_v26  ;;  %v195_v19 = vld [vmem:[#allocation5 + $0x2f8] sm:$0xff] }
  0xc0   :  { %821 = vmatpush.msra.mxu3 %v166_v23  ;;  %v294_v29 = vld [vmem:[#allocation5 + $0x610] sm:$0xff]  ;;  %860 = vmatpush.msra.mxu2 %v298_v25  ;;  %v111_v23 = vld [vmem:[#allocation5 + $0x58] sm:$0xff] }
  0xc1   :  { %867 = vmatpush.msra.mxu1 %v414_v24  ;;  %v238_v30 = vld [vmem:[#allocation5 + $0x450] sm:$0xff]  ;;  %822 = vmatmul.f32.vlgmr.msra.gmra.mxu3 %v1510_v22  ;;  %v191_v24 = vld [vmem:[#allocation5 + $0x2d8] sm:$0xff] }
  0xc2   :  { %v478_v31 = vld [vmem:[#allocation5 + $0xbd0] sm:$0xff]  ;;  %886 = vmatpush.msrb.mxu3 %v482_v27  ;;  %861 = vmatpush.msra.mxu2 %v294_v29  ;;  %v291_v26 = vld [vmem:[#allocation5 + $0x5f8] sm:$0xff] }
  0xc3   :  { %868 = vmatpush.msra.mxu1 %v410_v28  ;;  %v406_v33 = vld [vmem:[#allocation5 + $0x990] sm:$0xff]  ;;  %839 = vmatpush.msrb.mxu0 %v238_v30  ;;  %v107_v27 = vld [vmem:[#allocation5 + $0x38] sm:$0xff] }
  0xc4   :  { %v234_v34 = vld [vmem:[#allocation5 + $0x430] sm:$0xff]  ;;  %887 = vmatpush.msrb.mxu3 %v478_v31  ;;  %926 = vmatpush.msrb.mxu2 %v163_v32  ;;  %v187_v28 = vld [vmem:[#allocation5 + $0x2b8] sm:$0xff] }
  0xc5   :  { %v474_v35 = vld [vmem:[#allocation5 + $0xbb0] sm:$0xff]  ;;  %869 = vmatpush.msra.mxu1 %v406_v33  ;;  %840 = vmatpush.msrb.mxu0 %v234_v34  ;;  %v287_v29 = vld [vmem:[#allocation5 + $0x5d8] sm:$0xff] }
  0xc6   :  { %v402_v37 = vld [vmem:[#allocation5 + $0x970] sm:$0xff]  ;;  %888 = vmatpush.msrb.mxu3 %v474_v35  ;;  %927 = vmatpush.msrb.mxu2 %v159_v36  ;;  %v355_v30 = vld [vmem:[#allocation5 + $0x7f8] sm:$0xff] }
  0xc7   :  { %v230_v38 = vld [vmem:[#allocation5 + $0x410] sm:$0xff]  ;;  %870 = vmatpush.msra.mxu1 %v402_v37  ;;  %862 = vmatmul.f32.vlgmr.msra.gmra.mxu2 %v1506_v17  ;;  %v223_v17 = vld [vmem:[#allocation5 + $0x3d8] sm:$0xff] }
  0xc8   :  { %v470_v39 = vld [vmem:[#allocation5 + $0xb90] sm:$0xff]  ;;  %802 = vmatmul.f32.vlgmr.msrb.gmra.mxu1 %v1504_v16  ;;  %841 = vmatpush.msrb.mxu0 %v230_v38  ;;  %v103_v31 = vld [vmem:[#allocation5 + $0x18] sm:$0xff] }
  0xc9   :  { %v398_v41 = vld [vmem:[#allocation5 + $0x950] sm:$0xff]  ;;  %889 = vmatpush.msrb.mxu3 %v470_v39  ;;  %928 = vmatpush.msrb.mxu2 %v155_v40  ;;  %v183_v32 = vld [vmem:[#allocation5 + $0x298] sm:$0xff] }
  0xca   :  { %v490_v22 = vld [vmem:[#allocation5 + $0xc30] sm:$0xff]  ;;  %871 = vmatpush.msra.mxu1 %v398_v41  ;;  %842 = vmatmul.f32.vlgmr.msrb.gmra.mxu0 %v1501_v11  ;;  %v419_v33 = vld [vmem:[#allocation5 + $0x9f8] sm:$0xff] }
  0xcb   :  { %v466_v42 = vld [vmem:[#allocation5 + $0xb70] sm:$0xff]  ;;  %920 = vmatpush.msra.mxu0 %v490_v22  ;;  %929 = vmatpush.msrb.mxu2 %v151_v43  ;;  %v351_v34 = vld [vmem:[#allocation5 + $0x7d8] sm:$0xff] }
  0xcc   :  { %v394_v44 = vld [vmem:[#allocation5 + $0x930] sm:$0xff]  ;;  %890 = vmatpush.msrb.mxu3 %v466_v42  ;;  %v415_v35 = vld [vmem:[#allocation5 + $0x9d8] sm:$0xff] }
  0xcd   :  { %v486_v45 = vld [vmem:[#allocation5 + $0xc10] sm:$0xff]  ;;  %872 = vmatpush.msra.mxu1 %v394_v44  ;;  %930 = vmatpush.msrb.mxu2 %v147_v47  ;;  %v347_v36 = vld [vmem:[#allocation5 + $0x7b8] sm:$0xff] }
  0xce   :  { %v462_v46 = vld [vmem:[#allocation5 + $0xb50] sm:$0xff]  ;;  %921 = vmatpush.msra.mxu0 %v486_v45  ;;  %v283_v37 = vld [vmem:[#allocation5 + $0x5b8] sm:$0xff] }
  0xcf   :  { %v390_v49 = vld [vmem:[#allocation5 + $0x910] sm:$0xff]  ;;  %891 = vmatpush.msrb.mxu3 %v462_v46  ;;  %931 = vmatpush.msrb.mxu2 %v143_v50  ;;  %v175_v38 = vld [vmem:[#allocation5 + $0x258] sm:$0xff] }
  0xd0   :  { %v458_v16 = vld [vmem:[#allocation5 + $0xb30] sm:$0xff]  ;;  %946 = vmatpush.msrb.mxu0 %v227_v48  ;;  %873 = vmatpush.msra.mxu1 %v390_v49  ;;  %v411_v39 = vld [vmem:[#allocation5 + $0x9b8] sm:$0xff] }
  0xd1   :  { %v386_v51 = vld [vmem:[#allocation5 + $0x8f0] sm:$0xff]  ;;  %892 = vmatpush.msrb.mxu3 %v458_v16  ;;  %932 = vmatpush.msrb.mxu2 %v139_v53  ;;  %v343_v40 = vld [vmem:[#allocation5 + $0x798] sm:$0xff] }
  0xd2   :  { %v454_v52 = vld [vmem:[#allocation5 + $0xb10] sm:$0xff]  ;;  %947 = vmatpush.msrb.mxu0 %v223_v17  ;;  %874 = vmatpush.msra.mxu1 %v386_v51  ;;  %v171_v41 = vld [vmem:[#allocation5 + $0x238] sm:$0xff] }
  0xd3   :  { %v382_v55 = vld [vmem:[#allocation5 + $0x8d0] sm:$0xff]  ;;  %893 = vmatpush.msrb.mxu3 %v454_v52  ;;  %933 = vmatpush.msrb.mxu2 %v135_v57  ;;  %v407_v22 = vld [vmem:[#allocation5 + $0x998] sm:$0xff] }
  0xd4   :  { %v450_v56 = vld [vmem:[#allocation5 + $0xaf0] sm:$0xff]  ;;  %948 = vmatpush.msrb.mxu0 %v219_v54  ;;  %875 = vmatpush.msra.mxu1 %v382_v55  ;;  %v339_v42 = vld [vmem:[#allocation5 + $0x778] sm:$0xff] }
  0xd5   :  { %v378_v59 = vld [vmem:[#allocation5 + $0x8b0] sm:$0xff]  ;;  %894 = vmatpush.msrb.mxu3 %v450_v56  ;;  %934 = vmatpush.msrb.mxu2 %v131_v60  ;;  %v275_v43 = vld [vmem:[#allocation5 + $0x578] sm:$0xff] }
  0xd6   :  { %v446_v11 = vld [vmem:[#allocation5 + $0xad0] sm:$0xff]  ;;  %949 = vmatpush.msrb.mxu0 %v215_v58  ;;  %876 = vmatpush.msra.mxu1 %v378_v59  ;;  %v167_v44 = vld [vmem:[#allocation5 + $0x218] sm:$0xff] }
  0xd7   :  { %v374_v62 = vld [vmem:[#allocation5 + $0x890] sm:$0xff]  ;;  %895 = vmatpush.msrb.mxu3 %v446_v11  ;;  %935 = vmatpush.msrb.mxu2 %v127_v1  ;;  %v403_v45 = vld [vmem:[#allocation5 + $0x978] sm:$0xff] }
  0xd8   :  { %v442_v0 = vld [vmem:[#allocation5 + $0xab0] sm:$0xff]  ;;  %950 = vmatpush.msrb.mxu0 %v211_v61  ;;  %877 = vmatpush.msra.mxu1 %v374_v62  ;;  %v335_v46 = vld [vmem:[#allocation5 + $0x758] sm:$0xff] }
  0xd9   :  { %v370_v3 = vld [vmem:[#allocation5 + $0x870] sm:$0xff]  ;;  %896 = vmatpush.msrb.mxu3 %v442_v0  ;;  %936 = vmatpush.msrb.mxu2 %v123_v6  ;;  %v399_v47 = vld [vmem:[#allocation5 + $0x958] sm:$0xff] }
  0xda   :  { %v438_v5 = vld [vmem:[#allocation5 + $0xa90] sm:$0xff]  ;;  %951 = vmatpush.msrb.mxu0 %v207_v2  ;;  %878 = vmatpush.msra.mxu1 %v370_v3  ;;  %v271_v48 = vld [vmem:[#allocation5 + $0x558] sm:$0xff] }
  0xdb   :  { %v366_v9 = vld [vmem:[#allocation5 + $0x850] sm:$0xff]  ;;  %897 = vmatpush.msrb.mxu3 %v438_v5  ;;  %937 = vmatpush.msrb.mxu2 %v119_v12  ;;  %v331_v49 = vld [vmem:[#allocation5 + $0x738] sm:$0xff] }
  0xdc   :  { %v434_v10 = vld [vmem:[#allocation5 + $0xa70] sm:$0xff]  ;;  %952 = vmatpush.msrb.mxu0 %v203_v7  ;;  %879 = vmatpush.msra.mxu1 %v366_v9  ;;  %v479_v16 = vld [vmem:[#allocation5 + $0xbd8] sm:$0xff] }
  0xdd   :  { %v362_v14 = vld [vmem:[#allocation5 + $0x830] sm:$0xff]  ;;  %898 = vmatpush.msrb.mxu3 %v434_v10  ;;  %938 = vmatpush.msrb.mxu2 %v115_v18  ;;  %v395_v50 = vld [vmem:[#allocation5 + $0x938] sm:$0xff] }
  0xde   :  { %v430_v15 = vld [vmem:[#allocation5 + $0xa50] sm:$0xff]  ;;  %953 = vmatpush.msrb.mxu0 %v199_v13  ;;  %880 = vmatpush.msra.mxu1 %v362_v14  ;;  %v267_v17 = vld [vmem:[#allocation5 + $0x538] sm:$0xff] }
  0xdf   :  { %v358_v20 = vld [vmem:[#allocation5 + $0x810] sm:$0xff]  ;;  %899 = vmatpush.msrb.mxu3 %v430_v15  ;;  %939 = vmatpush.msrb.mxu2 %v111_v23  ;;  %v327_v51 = vld [vmem:[#allocation5 + $0x718] sm:$0xff] }
  0xe0   :  { %v426_v21 = vld [vmem:[#allocation5 + $0xa30] sm:$0xff]  ;;  %954 = vmatpush.msrb.mxu0 %v195_v19  ;;  %881 = vmatpush.msra.mxu1 %v358_v20  ;;  %v475_v52 = vld [vmem:[#allocation5 + $0xbb8] sm:$0xff]  ;;  %v1287_v19 = vld [vmem:[#allocation2] sm:$0xff] }
  0xe1   :  { %v422_v25 = vld [vmem:[#allocation5 + $0xa10] sm:$0xff]  ;;  %882 = vmatmul.f32.vlgmr.msra.gmra.mxu1 %v1517_v4  ;;  %900 = vmatpush.msrb.mxu3 %v426_v21  ;;  %v179_v4 = vld [vmem:[#allocation5 + $0x278] sm:$0xff] }
  0xe2   :  { %955 = vmatpush.msrb.mxu0 %v191_v24  ;;  %966 = vmatpush.msrb.mxu1 %v291_v26  ;;  %v391_v53 = vld [vmem:[#allocation5 + $0x918] sm:$0xff] }
  0xe3   :  { %901 = vmatpush.msrb.mxu3 %v422_v25  ;;  %940 = vmatpush.msrb.mxu2 %v107_v27  ;;  %v263_v54 = vld [vmem:[#allocation5 + $0x518] sm:$0xff]  ;;  %v1539_v27 = vld [vmem:[#allocation7] sm:$0xf] }
  0xe4   :  { %956 = vmatpush.msrb.mxu0 %v187_v28  ;;  %902 = vmatmul.f32.vlgmr.msrb.gmra.mxu3 %v1519_v8  ;;  %v279_v8 = vld [vmem:[#allocation5 + $0x598] sm:$0xff] }
  0xe5   :  { %967 = vmatpush.msrb.mxu1 %v287_v29  ;;  %986 = vmatpush.msra.mxu3 %v355_v30  ;;  %v323_v55 = vld [vmem:[#allocation5 + $0x6f8] sm:$0xff] }
  0xe6   :  { %941 = vmatpush.msrb.mxu2 %v103_v31  ;;  %957 = vmatpush.msrb.mxu0 %v183_v32  ;;  %v471_v56 = vld [vmem:[#allocation5 + $0xb98] sm:$0xff]  ;;  %v494_v32 = vperm.slane %v1539_v27, 0 }
  0xe7   :  { %987 = vmatpush.msra.mxu3 %v351_v34  ;;  %1262 = vmatmul.msk.f32.vlgmr.msra.gmra.mxu0 %vm502_vm0, %v1513_v63  ;;  %v483_v63 = vld [vmem:[#allocation5 + $0xbf8] sm:$0xff] }
  0xe8   :  { %1006 = vmatpush.msra.mxu2 %v419_v33  ;;  %958 = vmatpush.msrb.mxu0 %v179_v4  ;;  %v387_v57 = vld [vmem:[#allocation5 + $0x8f8] sm:$0xff]  ;;  %v1288_v33 = vld [vmem:[#allocation2 + $0x18] sm:$0xff]  ;;  %v523_v4 = vpop.f32.mrf.mxu0 }
  0xe9   :  { %988 = vmatpush.msra.mxu3 %v347_v36  ;;  %968 = vmatpush.msrb.mxu1 %v283_v37  ;;  %v259_v58 = vld [vmem:[#allocation5 + $0x4f8] sm:$0xff]  ;;  %v1289_v37 = vld [vmem:[#allocation2 + $0x20] sm:$0xff] }
  0xea   :  { %1007 = vmatpush.msra.mxu2 %v415_v35  ;;  %959 = vmatpush.msrb.mxu0 %v175_v38  ;;  %v319_v59 = vld [vmem:[#allocation5 + $0x6d8] sm:$0xff]  ;;  %v1083_v38 = vld [vmem:[#allocation8 + $0x68] sm:$0xff] }
  0xeb   :  { %989 = vmatpush.msra.mxu3 %v343_v40  ;;  %969 = vmatpush.msrb.mxu1 %v279_v8  ;;  %v467_v11 = vld [vmem:[#allocation5 + $0xb78] sm:$0xff] }
  0xec   :  { %1008 = vmatpush.msra.mxu2 %v411_v39  ;;  %960 = vmatpush.msrb.mxu0 %v171_v41  ;;  %v383_v60 = vld [vmem:[#allocation5 + $0x8d8] sm:$0xff]  ;;  %v1290_v39 = vld [vmem:[#allocation2 + $0x8] sm:$0xff]  ;;  %v524_v41 = vadd.f32 %v523_v4, %v494_v32 }
  0xed   :  { %990 = vmatpush.msra.mxu3 %v339_v42  ;;  %970 = vmatpush.msrb.mxu1 %v275_v43  ;;  %v255_v61 = vld [vmem:[#allocation5 + $0x4d8] sm:$0xff]  ;;  %v543_v42 = vpop.f32.mrf.mxu1 }
  0xee   :  { %1009 = vmatpush.msra.mxu2 %v407_v22  ;;  %961 = vmatpush.msrb.mxu0 %v167_v44  ;;  %v315_v62 = vld [vmem:[#allocation5 + $0x6b8] sm:$0xff]  ;;  %v1082_v22 = vld [vmem:[#allocation8 + $0x60] sm:$0xff] }
  0xef   :  { %991 = vmatpush.msra.mxu3 %v335_v46  ;;  %971 = vmatpush.msrb.mxu1 %v271_v48  ;;  %v463_v0 = vld [vmem:[#allocation5 + $0xb58] sm:$0xff]  ;;  %v544_v48 = vadd.f32 %v543_v42, %v524_v41 }
  0xf0   :  { %1010 = vmatpush.msra.mxu2 %v403_v45  ;;  %1026 = vmatpush.msra.mxu0 %v483_v63  ;;  %v379_v1 = vld [vmem:[#allocation5 + $0x8b8] sm:$0xff] }
  0xf1   :  { %992 = vmatpush.msra.mxu3 %v331_v49  ;;  %972 = vmatpush.msrb.mxu1 %v267_v17  ;;  %v251_v2 = vld [vmem:[#allocation5 + $0x4b8] sm:$0xff]  ;;  %v563_v49 = vpop.f32.mrf.mxu2  ;;  %v583_v17 = vpop.f32.mrf.mxu3 }
  0xf2   :  { %1011 = vmatpush.msra.mxu2 %v399_v47  ;;  %1027 = vmatpush.msra.mxu0 %v479_v16  ;;  %v311_v3 = vld [vmem:[#allocation5 + $0x698] sm:$0xff] }
  0xf3   :  { %993 = vmatpush.msra.mxu3 %v327_v51  ;;  %973 = vmatpush.msrb.mxu1 %v263_v54  ;;  %v459_v5 = vld [vmem:[#allocation5 + $0xb38] sm:$0xff]  ;;  %v1079_v51 = vld [vmem:[#allocation8 + $0x48] sm:$0xff]  ;;  %v564_v54 = vadd.f32 %v563_v49, %v544_v48  ;;  %v1110_v48 = vld [vmem:[#allocation8 + $0x140] sm:$0xff] }
  0xf4   :  { %1012 = vmatpush.msra.mxu2 %v395_v50  ;;  %1028 = vmatpush.msra.mxu0 %v475_v52  ;;  %v375_v6 = vld [vmem:[#allocation5 + $0x898] sm:$0xff]  ;;  %v1292_v52 = vld [vmem:[#allocation2 + $0x28] sm:$0xff] }
  0xf5   :  { %994 = vmatpush.msra.mxu3 %v323_v55  ;;  %974 = vmatpush.msrb.mxu1 %v259_v58  ;;  %v247_v7 = vld [vmem:[#allocation5 + $0x498] sm:$0xff]  ;;  %v1078_v55 = vld [vmem:[#allocation8 + $0x40] sm:$0xff] }
  0xf6   :  { %1013 = vmatpush.msra.mxu2 %v391_v53  ;;  %1029 = vmatpush.msra.mxu0 %v471_v56  ;;  %v307_v9 = vld [vmem:[#allocation5 + $0x678] sm:$0xff]  ;;  %v1099_v53 = vld [vmem:[#allocation8 + $0xe8] sm:$0xff] }
  0xf7   :  { %995 = vmatpush.msra.mxu3 %v319_v59  ;;  %975 = vmatpush.msrb.mxu1 %v255_v61  ;;  %v455_v10 = vld [vmem:[#allocation5 + $0xb18] sm:$0xff] }
  0xf8   :  { %1014 = vmatpush.msra.mxu2 %v387_v57  ;;  %1030 = vmatpush.msra.mxu0 %v467_v11  ;;  %v243_v12 = vld [vmem:[#allocation5 + $0x478] sm:$0xff]  ;;  %v1098_v57 = vld [vmem:[#allocation8 + $0xe0] sm:$0xff]  ;;  %v603_v59 = vpop.f32.mrf.mxu0 }
  0xf9   :  { %996 = vmatpush.msra.mxu3 %v315_v62  ;;  %976 = vmatpush.msrb.mxu1 %v251_v2  ;;  %v303_v13 = vld [vmem:[#allocation5 + $0x658] sm:$0xff] }
  0xfa   :  { %1015 = vmatpush.msra.mxu2 %v383_v60  ;;  %1031 = vmatpush.msra.mxu0 %v463_v0  ;;  %v371_v14 = vld [vmem:[#allocation5 + $0x878] sm:$0xff]  ;;  %v584_v60 = vadd.f32 %v583_v17, %v564_v54  ;;  %v495_v0 = vperm.slane %v1539_v27, 1  ;;  %v1106_v17 = vld [vmem:[#allocation8 + $0x120] sm:$0xff] }
  0xfb   :  { %997 = vmatpush.msra.mxu3 %v311_v3  ;;  %977 = vmatpush.msrb.mxu1 %v247_v7  ;;  %v451_v15 = vld [vmem:[#allocation5 + $0xaf8] sm:$0xff]  ;;  %v643_v61 = vpop.f32.mrf.mxu2  ;;  %v1075_v3 = vld [vmem:[#allocation8 + $0x28] sm:$0xff]  ;;  %v1102_v54 = vld [vmem:[#allocation8 + $0x100] sm:$0xff] }
  0xfc   :  { %1016 = vmatpush.msra.mxu2 %v379_v1  ;;  %1032 = vmatpush.msra.mxu0 %v459_v5  ;;  %v239_v18 = vld [vmem:[#allocation5 + $0x458] sm:$0xff]  ;;  %v604_v2 = vadd.f32 %v603_v59, %v584_v60  ;;  %v1095_v7 = vld [vmem:[#allocation8 + $0xc8] sm:$0xff]  ;;  %v496_v59 = vperm.slane %v1539_v27, 2 }
  0xfd   :  { %998 = vmatpush.msra.mxu3 %v307_v9  ;;  %942 = vmatmul.f32.vlgmr.msrb.gmra.mxu2 %v1287_v19  ;;  %v299_v20 = vld [vmem:[#allocation5 + $0x638] sm:$0xff]  ;;  %v1074_v9 = vld [vmem:[#allocation8 + $0x20] sm:$0xff] }
  0xfe   :  { %1017 = vmatpush.msra.mxu2 %v375_v6  ;;  %1033 = vmatpush.msra.mxu0 %v455_v10  ;;  %v367_v21 = vld [vmem:[#allocation5 + $0x858] sm:$0xff]  ;;  %v623_v6 = vpop.f32.mrf.mxu1 }
  0xff   :  { %978 = vmatpush.msrb.mxu1 %v243_v12  ;;  %999 = vmatpush.msra.mxu3 %v303_v13  ;;  %v447_v23 = vld [vmem:[#allocation5 + $0xad8] sm:$0xff]  ;;  %v1094_v12 = vld [vmem:[#allocation8 + $0xc0] sm:$0xff]  ;;  %v624_v13 = vadd.f32 %v623_v6, %v604_v2 }
 0x100   :  { %1018 = vmatpush.msra.mxu2 %v371_v14  ;;  %v235_v24 = vld [vmem:[#allocation5 + $0x438] sm:$0xff]  ;;  %1034 = vmatpush.msra.mxu0 %v451_v15 }
 0x101   :  { %979 = vmatpush.msrb.mxu1 %v239_v18  ;;  %v295_v25 = vld [vmem:[#allocation5 + $0x618] sm:$0xff]  ;;  %1000 = vmatpush.msra.mxu3 %v299_v20 }
 0x102   :  { %v363_v26 = vld [vmem:[#allocation5 + $0x838] sm:$0xff]  ;;  %1019 = vmatpush.msra.mxu2 %v367_v21  ;;  %1035 = vmatpush.msra.mxu0 %v447_v23  ;;  %v644_v23 = vadd.f32 %v643_v61, %v624_v13 }
 0x103   :  { %v443_v28 = vld [vmem:[#allocation5 + $0xab8] sm:$0xff]  ;;  %980 = vmatpush.msrb.mxu1 %v235_v24  ;;  %1001 = vmatpush.msra.mxu3 %v295_v25  ;;  %v1071_v24 = vld [vmem:[#allocation8 + $0x8] sm:$0xff] }
 0x104   :  { %v1085_v29 = vld [vmem:[#allocation8 + $0x78] sm:$0xff]  ;;  %1020 = vmatpush.msra.mxu2 %v363_v26  ;;  %1036 = vmatpush.msra.mxu0 %v443_v28  ;;  %v1084_v34 = vld [vmem:[#allocation8 + $0x70] sm:$0xff]  ;;  %v1091_v25 = vld [vmem:[#allocation8 + $0xa8] sm:$0xff]  ;;  %v1066_v32 = vmax.f32 %v644_v23, 0.0 }
 0x105   :  { %v359_v30 = vld [vmem:[#allocation5 + $0x818] sm:$0xff]  ;;  %1002 = vmatmul.f32.vlgmr.msra.gmra.mxu3 %v1288_v33  ;;  %962 = vmatmul.f32.vlgmr.msrb.gmra.mxu0 %v1290_v39  ;;  %v1070_v26 = vld [vmem:[#allocation8] sm:$0xff] }
 0x106   :  { %v439_v31 = vld [vmem:[#allocation5 + $0xa98] sm:$0xff]  ;;  %1138 = vmatpush.msrb.mxu3 %v1085_v29  ;;  %1021 = vmatpush.msra.mxu2 %v359_v30 }
 0x107   :  { %v231_v35 = vld [vmem:[#allocation5 + $0x418] sm:$0xff]  ;;  %1037 = vmatpush.msra.mxu0 %v439_v31  ;;  %1022 = vmatmul.f32.vlgmr.msra.gmra.mxu2 %v1289_v37  ;;  %v1090_v31 = vld [vmem:[#allocation8 + $0xa0] sm:$0xff] }
 0x108   :  { %v435_v36 = vld [vmem:[#allocation5 + $0xa78] sm:$0xff]  ;;  %1139 = vmatpush.msrb.mxu3 %v1084_v34  ;;  %981 = vmatpush.msrb.mxu1 %v231_v35 }
 0x109   :  { %v491_v40 = vld [vmem:[#allocation5 + $0xc38] sm:$0xff]  ;;  %1038 = vmatpush.msra.mxu0 %v435_v36 }
 0x10a   :  { %v431_v8 = vld [vmem:[#allocation5 + $0xa58] sm:$0xff]  ;;  %1140 = vmatpush.msrb.mxu3 %v1083_v38  ;;  %1060 = vmatpush.msra.mxu1 %v491_v40  ;;  %v1087_v38 = vld [vmem:[#allocation8 + $0x88] sm:$0xff] }
 0x10b   :  { %v1291_v43 = vld [vmem:[#allocation2 + $0x10] sm:$0xff]  ;;  %1039 = vmatpush.msra.mxu0 %v431_v8  ;;  %v1086_v8 = vld [vmem:[#allocation8 + $0x80] sm:$0xff] }
 0x10c   :  { %982 = vmatmul.f32.vlgmr.msrb.gmra.mxu1 %v1291_v43  ;;  %v427_v44 = vld [vmem:[#allocation5 + $0xa38] sm:$0xff]  ;;  %1141 = vmatpush.msrb.mxu3 %v1082_v22 }
 0x10d   :  { %v487_v45 = vld [vmem:[#allocation5 + $0xc18] sm:$0xff]  ;;  %1040 = vmatpush.msra.mxu0 %v427_v44  ;;  %v1115_v44 = vld [vmem:[#allocation8 + $0x168] sm:$0xff] }
 0x10e   :  { %v1081_v46 = vld [vmem:[#allocation8 + $0x58] sm:$0xff]  ;;  %1061 = vmatpush.msra.mxu1 %v487_v45  ;;  %v1080_v16 = vld [vmem:[#allocation8 + $0x50] sm:$0xff]  ;;  %v1114_v45 = vld [vmem:[#allocation8 + $0x160] sm:$0xff] }
 0x10f   :  { %v1101_v63 = vld [vmem:[#allocation8 + $0xf8] sm:$0xff]  ;;  %1142 = vmatpush.msrb.mxu3 %v1081_v46  ;;  %v1100_v50 = vld [vmem:[#allocation8 + $0xf0] sm:$0xff] }
 0x110   :  { %v423_v47 = vld [vmem:[#allocation5 + $0xa18] sm:$0xff]  ;;  %1158 = vmatpush.msrb.mxu1 %v1101_v63 }
 0x111   :  { %1041 = vmatpush.msra.mxu0 %v423_v47  ;;  %1143 = vmatpush.msrb.mxu3 %v1080_v16  ;;  %v1293_v56 = vld [vmem:[#allocation2 + $0x30] sm:$0xff]  ;;  %v1111_v47 = vld [vmem:[#allocation8 + $0x148] sm:$0xff] }
 0x112   :  { %1042 = vmatmul.f32.vlgmr.msra.gmra.mxu0 %v1292_v52  ;;  %1159 = vmatpush.msrb.mxu1 %v1100_v50  ;;  %v1077_v58 = vld [vmem:[#allocation8 + $0x38] sm:$0xff]  ;;  %v1076_v62 = vld [vmem:[#allocation8 + $0x30] sm:$0xff]  ;;  %v1107_v50 = vld [vmem:[#allocation8 + $0x128] sm:$0xff] }
 0x113   :  { %1144 = vmatpush.msrb.mxu3 %v1079_v51  ;;  %v1097_v11 = vld [vmem:[#allocation8 + $0xd8] sm:$0xff]  ;;  %v1096_v1 = vld [vmem:[#allocation8 + $0xd0] sm:$0xff] }
 0x114   :  { %1263 = vmatmul.msk.f32.vlgmr.msra.gmra.mxu1 %vm502_vm0, %v1293_v56  ;;  %v663_v5 = vpop.f32.mrf.mxu3  ;;  %v1073_v14 = vld [vmem:[#allocation8 + $0x18] sm:$0xff]  ;;  %v1072_v18 = vld [vmem:[#allocation8 + $0x10] sm:$0xff] }
 0x115   :  { %1160 = vmatpush.msrb.mxu1 %v1099_v53  ;;  %1145 = vmatpush.msrb.mxu3 %v1078_v55  ;;  %v664_v10 = vadd.f32 %v663_v5, %v495_v0  ;;  %v1093_v15 = vld [vmem:[#allocation8 + $0xb8] sm:$0xff]  ;;  %v1092_v21 = vld [vmem:[#allocation8 + $0xb0] sm:$0xff]  ;;  %v1103_v53 = vld [vmem:[#allocation8 + $0x108] sm:$0xff] }
 0x116   :  { %v1089_v34 = vld [vmem:[#allocation8 + $0x98] sm:$0xff]  ;;  %v1088_v35 = vld [vmem:[#allocation8 + $0x90] sm:$0xff]  ;;  %v1127_v0 = vld [vmem:[#allocation8 + $0x1c8] sm:$0xff] }
 0x117   :  { %1161 = vmatpush.msrb.mxu1 %v1098_v57  ;;  %1146 = vmatpush.msrb.mxu3 %v1077_v58  ;;  %v1117_v42 = vld [vmem:[#allocation8 + $0x178] sm:$0xff]  ;;  %v1116_v43 = vld [vmem:[#allocation8 + $0x170] sm:$0xff]  ;;  %v1131_v57 = vld [vmem:[#allocation8 + $0x1e8] sm:$0xff] }
 0x118   :  { %1178 = vmatpush.msrb.mxu2 %v1117_v42  ;;  %v1113_v46 = vld [vmem:[#allocation8 + $0x158] sm:$0xff]  ;;  %v1112_v63 = vld [vmem:[#allocation8 + $0x150] sm:$0xff]  ;;  %v1130_v58 = vld [vmem:[#allocation8 + $0x1e0] sm:$0xff] }
 0x119   :  { %1162 = vmatpush.msrb.mxu1 %v1097_v11  ;;  %1147 = vmatpush.msrb.mxu3 %v1076_v62  ;;  %v1109_v49 = vld [vmem:[#allocation8 + $0x138] sm:$0xff]  ;;  %v1108_v16 = vld [vmem:[#allocation8 + $0x130] sm:$0xff] }
 0x11a   :  { %1179 = vmatpush.msrb.mxu2 %v1116_v43  ;;  %v1105_v51 = vld [vmem:[#allocation8 + $0x118] sm:$0xff]  ;;  %v1104_v52 = vld [vmem:[#allocation8 + $0x110] sm:$0xff]  ;;  %v1282_v43 = vld [vmem:[#allocation10] ss:$0 sm:$0xff] }
 0x11b   :  { %1163 = vmatpush.msrb.mxu1 %v1096_v1  ;;  %1148 = vmatpush.msrb.mxu3 %v1075_v3  ;;  %v683_v19 = vpop.f32.mrf.mxu2  ;;  %v1133_v55 = vld [vmem:[#allocation8 + $0x1f8] sm:$0xff]  ;;  %v1132_v56 = vld [vmem:[#allocation8 + $0x1f0] sm:$0xff] }
 0x11c   :  { %v684_v20 = vadd.f32 %v683_v19, %v664_v10  ;;  %1180 = vmatpush.msrb.mxu2 %v1115_v44  ;;  %1198 = vmatpush.msrb.mxu0 %v1133_v55  ;;  %v1129_v11 = vld [vmem:[#allocation8 + $0x1d8] sm:$0xff]  ;;  %v1128_v61 = vld [vmem:[#allocation8 + $0x1d0] sm:$0xff]  ;;  %v1123_v19 = vld [vmem:[#allocation8 + $0x1a8] sm:$0xff] }
 0x11d   :  { %1164 = vmatpush.msrb.mxu1 %v1095_v7  ;;  %1149 = vmatpush.msrb.mxu3 %v1074_v9  ;;  %v723_v33 = vpop.f32.mrf.mxu1  ;;  %v1126_v7 = vld [vmem:[#allocation8 + $0x1c0] sm:$0xff]  ;;  %v1125_v10 = vld [vmem:[#allocation8 + $0x1b8] sm:$0xff]  ;;  %v1124_v13 = vld [vmem:[#allocation8 + $0x1b0] sm:$0xff] }
 0x11e   :  { %1181 = vmatpush.msrb.mxu2 %v1114_v45  ;;  %1199 = vmatpush.msrb.mxu0 %v1132_v56 }
 0x11f   :  { %1165 = vmatpush.msrb.mxu1 %v1094_v12  ;;  %1150 = vmatpush.msrb.mxu3 %v1073_v14  ;;  %v703_v28 = vpop.f32.mrf.mxu0  ;;  %v743_v29 = vpop.f32.mrf.mxu3 }
 0x120   :  { %v704_v30 = vadd.f32 %v703_v28, %v684_v20  ;;  %1182 = vmatpush.msrb.mxu2 %v1113_v46  ;;  %1200 = vmatpush.msrb.mxu0 %v1131_v57  ;;  %v1119_v28 = vld [vmem:[#allocation8 + $0x188] sm:$0xff] }
 0x121   :  { %1166 = vmatpush.msrb.mxu1 %v1093_v15  ;;  %1151 = vmatpush.msrb.mxu3 %v1072_v18 }
 0x122   :  { %v724_v4 = vadd.f32 %v723_v33, %v704_v30  ;;  %1183 = vmatpush.msrb.mxu2 %v1112_v63  ;;  %1201 = vmatpush.msrb.mxu0 %v1130_v58  ;;  %v497_v30 = vperm.slane %v1539_v27, 3 }
 0x123   :  { %1167 = vmatpush.msrb.mxu1 %v1092_v21  ;;  %1152 = vmatpush.msrb.mxu3 %v1071_v24  ;;  %v1122_v21 = vld [vmem:[#allocation8 + $0x1a0] sm:$0xff]  ;;  %v1121_v24 = vld [vmem:[#allocation8 + $0x198] sm:$0xff] }
 0x124   :  { %v744_v36 = vadd.f32 %v743_v29, %v724_v4  ;;  %1184 = vmatpush.msrb.mxu2 %v1111_v47  ;;  %1202 = vmatpush.msrb.mxu0 %v1129_v11  ;;  %v1118_v29 = vld [vmem:[#allocation8 + $0x180] sm:$0xff] }
 0x125   :  { %1168 = vmatpush.msrb.mxu1 %v1091_v25  ;;  %1153 = vmatpush.msrb.mxu3 %v1070_v26  ;;  %v1120_v26 = vld [vmem:[#allocation8 + $0x190] sm:$0xff] }
 0x126   :  { %1154 = vmatmul.f32.vlgmr.msrb.gmra.mxu3 %v1066_v32  ;;  %v763_v37 = vpop.f32.mrf.mxu2  ;;  %1185 = vmatpush.msrb.mxu2 %v1110_v48 }
 0x127   :  { %1169 = vmatpush.msrb.mxu1 %v1090_v31  ;;  %v764_v39 = vadd.f32 %v763_v37, %v744_v36  ;;  %1203 = vmatpush.msrb.mxu0 %v1128_v61 }
 0x128   :  { %v783_v40 = vpop.f32.mrf.mxu3  ;;  %1186 = vmatpush.msrb.mxu2 %v1109_v49 }
 0x129   :  { %1170 = vmatpush.msrb.mxu1 %v1089_v34  ;;  %v784_v41 = vadd.f32 %v783_v40, %v764_v39  ;;  %1204 = vmatpush.msrb.mxu0 %v1127_v0 }
 0x12a   :  { %1187 = vmatpush.msrb.mxu2 %v1108_v16 }
 0x12b   :  { %1171 = vmatpush.msrb.mxu1 %v1088_v35  ;;  %v1067_v22 = vmax.f32 %v784_v41, 0.0  ;;  %1205 = vmatpush.msrb.mxu0 %v1126_v7 }
 0x12c   :  { %1188 = vmatpush.msrb.mxu2 %v1107_v50 }
 0x12d   :  { %1172 = vmatpush.msrb.mxu1 %v1087_v38  ;;  %1206 = vmatpush.msrb.mxu0 %v1125_v10 }
 0x12e   :  { %1189 = vmatpush.msrb.mxu2 %v1106_v17 }
 0x12f   :  { %1173 = vmatpush.msrb.mxu1 %v1086_v8  ;;  %1207 = vmatpush.msrb.mxu0 %v1124_v13 }
 0x130   :  { %1174 = vmatmul.f32.vlgmr.msrb.gmra.mxu1 %v1067_v22  ;;  %1190 = vmatpush.msrb.mxu2 %v1105_v51 }
 0x131   :  { %1208 = vmatpush.msrb.mxu0 %v1123_v19 }
 0x132   :  { %1191 = vmatpush.msrb.mxu2 %v1104_v52 }
 0x133   :  { %1209 = vmatpush.msrb.mxu0 %v1122_v21 }
 0x134   :  { %1192 = vmatpush.msrb.mxu2 %v1103_v53 }
 0x135   :  { %1210 = vmatpush.msrb.mxu0 %v1121_v24 }
 0x136   :  { %1193 = vmatpush.msrb.mxu2 %v1102_v54 }
 0x137   :  { %1211 = vmatpush.msrb.mxu0 %v1120_v26 }
 0x139   :  { %1212 = vmatpush.msrb.mxu0 %v1119_v28 }
 0x13b   :  { %1213 = vmatpush.msrb.mxu0 %v1118_v29 }
 0x144   :  { %v823_v1 = vpop.f32.mrf.mxu3 }
 0x145   :  { %v803_v60 = vpop.f32.mrf.mxu1 }
 0x146   :  { %v804_v62 = vadd.f32 %v803_v60, %v496_v59 }
 0x147   :  { %v843_v3 = vpop.f32.mrf.mxu0 }
 0x148   :  { %v824_v2 = vadd.f32 %v823_v1, %v804_v62 }
 0x14a   :  { %v844_v5 = vadd.f32 %v843_v3, %v824_v2  ;;  %v863_v6 = vpop.f32.mrf.mxu2 }
 0x14c   :  { %v864_v12 = vadd.f32 %v863_v6, %v844_v5 }
 0x15e   :  { %v883_v9 = vpop.f32.mrf.mxu1 }
 0x15f   :  { %v884_v14 = vadd.f32 %v883_v9, %v864_v12 }
 0x164   :  { %v923_v18 = vpop.f32.mrf.mxu0 }
 0x167   :  { %v903_v15 = vpop.f32.mrf.mxu3 }
 0x168   :  { %v904_v20 = vadd.f32 %v903_v15, %v884_v14 }
 0x16a   :  { %v924_v23 = vadd.f32 %v923_v18, %v904_v20 }
 0x16c   :  { %v1068_v25 = vmax.f32 %v924_v23, 0.0 }
 0x16e   :  { %1194 = vmatmul.f32.vlgmr.msrb.gmra.mxu2 %v1068_v25 }
 0x180   :  { %v943_v31 = vpop.f32.mrf.mxu2 }
 0x181   :  { %v944_v32 = vadd.f32 %v943_v31, %v497_v30 }
 0x182   :  { %v963_v33 = vpop.f32.mrf.mxu0 }
 0x183   :  { %v964_v34 = vadd.f32 %v963_v33, %v944_v32 }
 0x188   :  { %v1003_v36 = vpop.f32.mrf.mxu3 }
 0x189   :  { %v983_v4 = vpop.f32.mrf.mxu1 }
 0x18a   :  { %v984_v35 = vadd.f32 %v983_v4, %v964_v34  ;;  %v1023_v38 = vpop.f32.mrf.mxu2 }
 0x18c   :  { %v1004_v37 = vadd.f32 %v1003_v36, %v984_v35 }
 0x18e   :  { %v1024_v39 = vadd.f32 %v1023_v38, %v1004_v37 }
 0x18f   :  { %v1043_v40 = vpop.f32.mrf.mxu0 }
 0x190   :  { %v1044_v8 = vadd.f32 %v1043_v40, %v1024_v39 }
 0x191   :  { %v1063_v41 = vpop.f32.mrf.mxu1 }
 0x192   :  { %v1064_v22 = vadd.f32 %v1063_v41, %v1044_v8 }
 0x194   :  { %v1069_v42 = vmax.f32 %v1064_v22, 0.0 }
 0x196   :  { %1214 = vmatmul.f32.vlgmr.msrb.gmra.mxu0 %v1069_v42 }
 0x1a9   :  { %v1155_v44 = vpop.f32.mrf.mxu3 }
 0x1aa   :  { %v1156_v27 = vadd.f32 %v1282_v43, %v1155_v44 }
 0x1ad   :  { %v1175_v45 = vpop.f32.mrf.mxu1 }
 0x1ae   :  { %v1176_v63 = vadd.f32 %v1175_v45, %v1156_v27 }
 0x1f1   :  { %v1195_v46 = vpop.f32.mrf.mxu2 }
 0x1f2   :  { %v1196_v47 = vadd.f32 %v1195_v46, %v1176_v63 }
 0x213   :  { %v1215_v48 = vpop.f32.mrf.mxu0 }
 0x214   :  { %v1216_v49 = vadd.f32 %v1215_v48, %v1196_v47 }
 0x216   :  { %v1218_v16 = vsub.f32 0.0, %v1216_v49 }
 0x218   :  { %v1219_v50 = vmul.f32 1.442695, %v1218_v16 }
 0x21a   :  { %1283 = vpow2.f32 %v1219_v50 }
 0x220   :  { %v1284_v17 = vpop.eup %1283 }
 0x221   :  { %v1221_v51 = vadd.f32 1.0, %v1284_v17 }
 0x223   :  { %1285 = vrcp.f32 %v1221_v51  ;;  %v1233_v55 = vand.u32 2147483648, %v1221_v51  ;;  %v1231_v57 = vand.u32 2147483647, %v1221_v51  ;;  %vm1227_vm2 = vweird.f32 %v1221_v51 }
 0x225   :  { %v1234_v59 = vor.u32 1.1754944e-38, %v1233_v55  ;;  %vm1232_vm4 = vcmp.eq.f32.partialorder %v1231_v57, 8.507059e+37 }
 0x229   :  { %v1286_v52 = vpop.eup %1285 }
 0x22a   :  { %v1223_v53 = vmul.f32 %v1286_v52, %v1221_v51  ;;  %vm1228_vm1 = vweird.f32 %v1286_v52 }
 0x22b   :  { %vm1229_vm3 = vmor %vm1227_vm2, %vm1228_vm1 }
 0x22c   :  { %v1224_v54 = vsub.f32 1.0, %v1223_v53 }
 0x22e   :  { %v1225_v56 = vmul.f32 %v1286_v52, %v1224_v54 }
 0x230   :  { %v1226_v58 = vadd.f32 %v1286_v52, %v1225_v56 }
 0x232   :  { %v1230_v11 = vsel %vm1229_vm3, %v1286_v52, %v1226_v58 }
 0x233   :  { %v1235_v60 = vsel %vm1232_vm4, %v1234_v59, %v1230_v11 }
 0x234   :  { %v1237_v61 = vmul.f32 10000.0, %v1235_v60 }
 0x236   :  { %v1266_v62 = vcvt.f32.s32 %v1237_v61  ;;  %v1264_v1 = vand.u32 2147483647, %v1237_v61  ;;  %v1269_v3 = vand.u32 2147483648, %v1237_v61 }
 0x238   :  { %v1267_v0 = vcvt.s32.f32 %v1266_v62  ;;  %vm1265_vm5 = vcmp.lt.f32.partialorder %v1264_v1, 8388608.0 }
 0x23a   :  { %v1268_v2 = vand.u32 2147483647, %v1267_v0 }
 0x23c   :  { %v1270_v5 = vor.u32 %v1269_v3, %v1268_v2 }
 0x23e   :  { %v1271_v6 = vsel %vm1265_vm5, %v1270_v5, %v1237_v61 }
 0x23f   :  { %v1239_v7 = vmul.f32 0.0001, %v1271_v6 }
 0x241   :  { %1240 = vst [vmem:[#allocation11] sm:$0xff] %v1239_v7 }
 0x242   :  { %1251 = dma.vmem_to_hbm [thread:$0]  %s1247_s4, 128, %s1249_s21, [#allocation4]  }
 0x243   :  { %1444 = dma.done.wait [#allocation4], 128  }
 0x244   :  { %1445 = vsyncadd [#allocation4], 4294967168 }
 0x245   :  { %1256 = vsyncpa [#allocation3], 1 }
 0x246   :  { %1257 = vsyncpa [#allocation6], 1 }
 0x247   :  { %1258 = vsyncpa [#allocation9], 1 }
 0x248   :  { %1259 = vsyncpa [#allocation4], 1 }

</bundles_post_ra>
